<compile_context>
chip_gen: v6e
topology: v6e:2x2x1
jax: 0.10.0
libtpu: 0.0.40
codegen_flags: <defaults>
</compile_context>

<pallas_src>
import jax
import jax.numpy as jnp
from jax.experimental import pallas as pl
from jax.experimental.pallas import tpu as pltpu


# ---------------- model hyper-parameters (match the module) ----------------
dim = 50                      # embedding dim
N = 3                         # n-gram order
NCTX = N - 1                  # context tokens per example (2)
input_size = NCTX * dim       # 100
hidden_size = dim * 10        # 500
num_classes = 128             # stand-in for len(w2i); lane (128) aligned.
                              # NOTE: if a real vocab were padded up to a lane
                              # multiple, the log_softmax max/exp-sum below
                              # would need to mask padded classes with -inf.

# ---------------- hardware-padded dims ------------------------------------
IN_PAD = 128                  # input_size 100 -> 128 (lane-aligned K for dot1)
HID_PAD = 512                 # hidden_size 500 -> 512 (lane-aligned N / K)


def _round_up(x, m):
    return (x + m - 1) // m * m


def _choose_tb(b):
    """Batch-tile: big enough to amortize per-grid-step overhead, >=2 grid
    steps whenever B allows (keeps both v7x TensorCores busy), multiple of 8,
    capped at 1024 rows (VMEM working set stays < a few MiB)."""
    tb = min(1024, _round_up(max(b // 2, 1), 8))
    return max(tb, 8)


# ---------------------------- Pallas kernel --------------------------------
def mlp_logsoftmax_kernel(idx_ref, emb_ref, w1_ref, b1_ref, w2_ref, b2_ref,
                          out_ref):
    # idx_ref: (TB, NCTX)                int32  token ids for this batch tile
    # emb_ref: (NCTX, C, IN_PAD)         bf16   per-position embedding table;
    #                                           position p's table sits in
    #                                           input columns [p*dim,(p+1)*dim)
    # w1_ref : (IN_PAD, HID_PAD)         bf16   zero-padded l1 weight (in,out)
    # b1_ref : (1, HID_PAD)              f32    zero-padded l1 bias
    # w2_ref : (HID_PAD, C)              bf16   zero-padded l2 weight (in,out)
    # b2_ref : (1, C)                    f32    l2 bias
    # out_ref: (TB, C)                   bf16   per-row log-probabilities
    tb = idx_ref.shape[0]
    idx = idx_ref[...]                                        # (TB, NCTX) i32
    classes = jax.lax.broadcasted_iota(jnp.int32, (tb, num_classes), 1)

    # In-kernel embedding lookup as an exact one-hot MXU matmul.  Garbage ids
    # in a ragged last tile only change which (or no) row is selected, so the
    # padded rows are harmless and their outputs are dropped by the masked
    # output store.
    x = jnp.dot((classes == idx[:, 0:1]).astype(jnp.bfloat16), emb_ref[0],
                preferred_element_type=jnp.float32)           # (TB, IN_PAD)
    for p in range(1, NCTX):
        x = x + jnp.dot((classes == idx[:, p:p + 1]).astype(jnp.bfloat16),
                        emb_ref[p], preferred_element_type=jnp.float32)

    # l1 + ReLU (bias/ReLU in f32; x is exactly bf16-representable).
    h = jnp.dot(x.astype(jnp.bfloat16), w1_ref[...],
                preferred_element_type=jnp.float32)
    h = jnp.maximum(h + b1_ref[...], 0.0)

    # l2 logits.
    logits = jnp.dot(h.astype(jnp.bfloat16), w2_ref[...],
                     preferred_element_type=jnp.float32) + b2_ref[...]

    # Numerically stable log_softmax over the class (lane) axis, in f32; only
    # the final store is bf16.
    m = jnp.max(logits, axis=-1, keepdims=True)
    shifted = logits - m
    lse = jnp.log(jnp.sum(jnp.exp(shifted), axis=-1, keepdims=True))
    out_ref[...] = (shifted - lse).astype(out_ref.dtype)


# ------------------------- parameter preparation ---------------------------
def prepare_padded_params(params):
    """Zero-pad weights to hardware tiles, cast MXU operands to bf16 and build
    the position-stacked embedding table used by the in-kernel gather.

    Zero padding is numerically inert: padded input columns hit zero W1 rows,
    padded hidden units get b1 = 0 -> relu(0) = 0 and multiply zero W2 rows.
    Done once, outside the per-call path.
    """
    emb_bf = params["emb"].astype(jnp.bfloat16)               # (C, dim)
    emb_stack = jnp.zeros((NCTX, num_classes, IN_PAD), jnp.bfloat16)
    for p in range(NCTX):
        emb_stack = emb_stack.at[p, :, p * dim:(p + 1) * dim].set(emb_bf)

    w1 = jnp.pad(params["w1"],
                 ((0, IN_PAD - input_size), (0, HID_PAD - hidden_size)))
    b1 = jnp.pad(params["b1"], (0, HID_PAD - hidden_size)).reshape(1, HID_PAD)
    w2 = jnp.pad(params["w2"], ((0, HID_PAD - hidden_size), (0, 0)))
    b2 = params["b2"].reshape(1, num_classes)
    return {
        "emb_stack": emb_stack,                    # bf16, (NCTX, C, IN_PAD)
        "w1": w1.astype(jnp.bfloat16),
        "b1": b1.astype(jnp.float32),
        "w2": w2.astype(jnp.bfloat16),
        "b2": b2.astype(jnp.float32),
    }


# ------------------------------- forward -----------------------------------
@jax.jit
def net_forward(x_idx, padded):
    """Batched forward.  x_idx: (B, N-1) int32 token ids.

    Each row is one independent context (one PyTorch forward() call); returns
    (B, num_classes) bf16 log-probabilities.
    """
    B = x_idx.shape[0]
    tb = _choose_tb(B)

    return pl.pallas_call(
        mlp_logsoftmax_kernel,
        out_shape=jax.ShapeDtypeStruct((B, num_classes), jnp.bfloat16),
        grid=(pl.cdiv(B, tb),),
        in_specs=[
            pl.BlockSpec((tb, NCTX), lambda i: (i, 0)),                 # ids tile
            pl.BlockSpec((NCTX, num_classes, IN_PAD),
                         lambda i: (0, 0, 0)),                          # resident emb
            pl.BlockSpec((IN_PAD, HID_PAD), lambda i: (0, 0)),          # resident W1
            pl.BlockSpec((1, HID_PAD), lambda i: (0, 0)),               # resident b1
            pl.BlockSpec((HID_PAD, num_classes), lambda i: (0, 0)),     # resident W2
            pl.BlockSpec((1, num_classes), lambda i: (0, 0)),           # resident b2
        ],
        out_specs=pl.BlockSpec((tb, num_classes), lambda i: (i, 0)),
        compiler_params=pltpu.CompilerParams(
            # Batch axis is embarrassingly parallel -> both TCs on v7x.
            dimension_semantics=("parallel",),
        ),
    )(x_idx, padded["emb_stack"], padded["w1"], padded["b1"],
      padded["w2"], padded["b2"])


# ------------------------ deterministic parameter init ---------------------
def init_params(key):
    k_emb, k_w1, k_b1, k_w2, k_b2 = jax.random.split(key, 5)
    # nn.Embedding default: N(0, 1)
    emb = jax.random.normal(k_emb, (num_classes, dim), dtype=jnp.float32)
    # nn.Linear default: U(-1/sqrt(fan_in), 1/sqrt(fan_in)); stored transposed
    # vs. nn.Linear, i.e. (in, out), so the kernel computes y = x @ W + b.
    lim1 = 1.0 / (input_size ** 0.5)
    w1 = jax.random.uniform(k_w1, (input_size, hidden_size),
                            minval=-lim1, maxval=lim1, dtype=jnp.float32)
    b1 = jax.random.uniform(k_b1, (hidden_size,),
                            minval=-lim1, maxval=lim1, dtype=jnp.float32)
    lim2 = 1.0 / (hidden_size ** 0.5)
    w2 = jax.random.uniform(k_w2, (hidden_size, num_classes),
                            minval=-lim2, maxval=lim2, dtype=jnp.float32)
    b2 = jax.random.uniform(k_b2, (num_classes,),
                            minval=-lim2, maxval=lim2, dtype=jnp.float32)
    # bias1 / bias2 exist in the module but are unused in forward().
    return {"emb": emb, "w1": w1, "b1": b1, "w2": w2, "b2": b2,
            "bias1": jnp.zeros((1,), jnp.float32),
            "bias2": jnp.zeros((1,), jnp.float32)}


if __name__ == "__main__":
    key = jax.random.PRNGKey(0)
    k_params, k_idx = jax.random.split(key)
    params = init_params(k_params)
    padded = prepare_padded_params(params)

    # Batch of 300 contexts (deliberately NOT a multiple of the batch tile so
    # the ragged last block / masked store path is exercised), each with
    # (N-1)=2 token indices, deterministic.
    B = 300
    x_idx = jax.random.randint(k_idx, (B, NCTX), 0, num_classes,
                               dtype=jnp.int32)

    log_probs = net_forward(x_idx, padded)
    jax.block_until_ready(log_probs)

    # Pure-JAX reference with identical bf16 rounding of the MXU operands.
    x_f32 = jnp.take(params["emb"], x_idx.reshape(-1), axis=0)
    x_f32 = x_f32.reshape(B, input_size)
    x_bf = x_f32.astype(jnp.bfloat16).astype(jnp.float32)
    w1_bf = params["w1"].astype(jnp.bfloat16).astype(jnp.float32)
    w2_bf = params["w2"].astype(jnp.bfloat16).astype(jnp.float32)
    h_ref = jnp.maximum(x_bf @ w1_bf + params["b1"], 0.0)
    logits_ref = (h_ref.astype(jnp.bfloat16).astype(jnp.float32) @ w2_bf
                  + params["b2"])
    ref = jax.nn.log_softmax(logits_ref, axis=-1)

    out_f32 = log_probs.astype(jnp.float32)
    assert log_probs.shape == (B, num_classes)
    assert log_probs.dtype == jnp.bfloat16
    # bf16 output => ~half-ulp error of up to ~0.016 near |log p| ~ 5.
    assert bool(jnp.allclose(out_f32, ref, atol=6e-2, rtol=2e-2)), \
        "mismatch vs reference"
    assert bool(jnp.allclose(jnp.sum(jnp.exp(out_f32), axis=-1), 1.0,
                             atol=3e-2)), "rows are not normalized"

    print("KERNEL_OK")
</pallas_src>

<mosaic_0001>
module attributes {stable_mosaic.version = 11 : i64} {
  func.func @mlp_logsoftmax_kernel(%arg0: i32, %arg1: memref<152x2xi32, #tpu.memory_space<vmem>>, %arg2: memref<2x128x128xbf16, #tpu.memory_space<vmem>>, %arg3: memref<128x512xbf16, #tpu.memory_space<vmem>>, %arg4: memref<1x512xf32, #tpu.memory_space<vmem>>, %arg5: memref<512x128xbf16, #tpu.memory_space<vmem>>, %arg6: memref<1x128xf32, #tpu.memory_space<vmem>>, %arg7: memref<152x128xbf16, #tpu.memory_space<vmem>>) attributes {dimension_semantics = [#tpu.dimension_semantics<parallel>], iteration_bounds = array<i64: 2>, scalar_prefetch = 0 : i64, scratch_operands = 0 : i64, tpu.core_type = #tpu.core_type<tc>, window_params = [{transform_indices = @transform_0, window_bounds = array<i64: 152, 2>}, {pipeline_mode = #tpu.pipeline_mode<synchronous>, transform_indices = @transform_1, window_bounds = array<i64: 2, 128, 128>}, {pipeline_mode = #tpu.pipeline_mode<synchronous>, transform_indices = @transform_2, window_bounds = array<i64: 128, 512>}, {pipeline_mode = #tpu.pipeline_mode<synchronous>, transform_indices = @transform_3, window_bounds = array<i64: 1, 512>}, {pipeline_mode = #tpu.pipeline_mode<synchronous>, transform_indices = @transform_4, window_bounds = array<i64: 512, 128>}, {pipeline_mode = #tpu.pipeline_mode<synchronous>, transform_indices = @transform_5, window_bounds = array<i64: 1, 128>}, {transform_indices = @transform_6, window_bounds = array<i64: 152, 128>}]} {
    %c0 = arith.constant 0 : index
    %c0_0 = arith.constant 0 : index
    %0 = vector.load %arg1[%c0, %c0_0] : memref<152x2xi32, #tpu.memory_space<vmem>>, vector<152x2xi32>
    %1 = tpu.iota {dimensions = array<i32: 1>} : vector<152x128xi32>
    %2 = vector.extract_strided_slice %0 {offsets = [0, 0], sizes = [152, 1], strides = [1, 1]} : vector<152x2xi32> to vector<152x1xi32>
    %3 = vector.broadcast %2 : vector<152x1xi32> to vector<152x128xi32>
    %4 = arith.cmpi eq, %1, %3 : vector<152x128xi32>
    %5 = arith.extui %4 : vector<152x128xi1> to vector<152x128xi32>
    %6 = arith.sitofp %5 : vector<152x128xi32> to vector<152x128xf32>
    %7 = arith.truncf %6 : vector<152x128xf32> to vector<152x128xbf16>
    %c0_1 = arith.constant 0 : index
    %c0_2 = arith.constant 0 : index
    %c0_3 = arith.constant 0 : index
    %8 = vector.load %arg2[%c0_1, %c0_2, %c0_3] : memref<2x128x128xbf16, #tpu.memory_space<vmem>>, vector<1x128x128xbf16>
    %9 = vector.shape_cast %8 : vector<1x128x128xbf16> to vector<128x128xbf16>
    %cst = arith.constant dense<0.000000e+00> : vector<152x128xf32>
    %10 = tpu.matmul %7, %9, %cst {dimension_numbers = #tpu.dot_dimension_numbers<[1], [0], [0], [1], [0, 0, 1, 1], [], []>} : vector<152x128xbf16>, vector<128x128xbf16>, vector<152x128xf32> -> vector<152x128xf32>
    %11 = vector.extract_strided_slice %0 {offsets = [0, 1], sizes = [152, 1], strides = [1, 1]} : vector<152x2xi32> to vector<152x1xi32>
    %12 = vector.broadcast %11 : vector<152x1xi32> to vector<152x128xi32>
    %13 = arith.cmpi eq, %1, %12 : vector<152x128xi32>
    %14 = arith.extui %13 : vector<152x128xi1> to vector<152x128xi32>
    %15 = arith.sitofp %14 : vector<152x128xi32> to vector<152x128xf32>
    %16 = arith.truncf %15 : vector<152x128xf32> to vector<152x128xbf16>
    %c1 = arith.constant 1 : index
    %c0_4 = arith.constant 0 : index
    %c0_5 = arith.constant 0 : index
    %17 = vector.load %arg2[%c1, %c0_4, %c0_5] : memref<2x128x128xbf16, #tpu.memory_space<vmem>>, vector<1x128x128xbf16>
    %18 = vector.shape_cast %17 : vector<1x128x128xbf16> to vector<128x128xbf16>
    %cst_6 = arith.constant dense<0.000000e+00> : vector<152x128xf32>
    %19 = tpu.matmul %16, %18, %cst_6 {dimension_numbers = #tpu.dot_dimension_numbers<[1], [0], [0], [1], [0, 0, 1, 1], [], []>} : vector<152x128xbf16>, vector<128x128xbf16>, vector<152x128xf32> -> vector<152x128xf32>
    %20 = arith.addf %10, %19 : vector<152x128xf32>
    %21 = arith.truncf %20 : vector<152x128xf32> to vector<152x128xbf16>
    %c0_7 = arith.constant 0 : index
    %c0_8 = arith.constant 0 : index
    %22 = vector.load %arg3[%c0_7, %c0_8] : memref<128x512xbf16, #tpu.memory_space<vmem>>, vector<128x512xbf16>
    %cst_9 = arith.constant dense<0.000000e+00> : vector<152x512xf32>
    %23 = tpu.matmul %21, %22, %cst_9 {dimension_numbers = #tpu.dot_dimension_numbers<[1], [0], [0], [1], [0, 0, 1, 1], [], []>} : vector<152x128xbf16>, vector<128x512xbf16>, vector<152x512xf32> -> vector<152x512xf32>
    %c0_10 = arith.constant 0 : index
    %c0_11 = arith.constant 0 : index
    %24 = vector.load %arg4[%c0_10, %c0_11] : memref<1x512xf32, #tpu.memory_space<vmem>>, vector<1x512xf32>
    %25 = vector.broadcast %24 : vector<1x512xf32> to vector<152x512xf32>
    %26 = arith.addf %23, %25 : vector<152x512xf32>
    %cst_12 = arith.constant 0.000000e+00 : f32
    %27 = vector.broadcast %cst_12 : f32 to vector<152x512xf32>
    %28 = arith.maximumf %26, %27 : vector<152x512xf32>
    %29 = arith.truncf %28 : vector<152x512xf32> to vector<152x512xbf16>
    %c0_13 = arith.constant 0 : index
    %c0_14 = arith.constant 0 : index
    %30 = vector.load %arg5[%c0_13, %c0_14] : memref<512x128xbf16, #tpu.memory_space<vmem>>, vector<512x128xbf16>
    %cst_15 = arith.constant dense<0.000000e+00> : vector<152x128xf32>
    %31 = tpu.matmul %29, %30, %cst_15 {dimension_numbers = #tpu.dot_dimension_numbers<[1], [0], [0], [1], [0, 0, 1, 1], [], []>} : vector<152x512xbf16>, vector<512x128xbf16>, vector<152x128xf32> -> vector<152x128xf32>
    %c0_16 = arith.constant 0 : index
    %c0_17 = arith.constant 0 : index
    %32 = vector.load %arg6[%c0_16, %c0_17] : memref<1x128xf32, #tpu.memory_space<vmem>>, vector<1x128xf32>
    %33 = vector.broadcast %32 : vector<1x128xf32> to vector<152x128xf32>
    %34 = arith.addf %31, %33 : vector<152x128xf32>
    %cst_18 = arith.constant dense<0xFF800000> : vector<152xf32>
    %35 = vector.multi_reduction <maximumf>, %34, %cst_18 [1] : vector<152x128xf32> to vector<152xf32>
    %36 = vector.shape_cast %35 : vector<152xf32> to vector<152x1xf32>
    %37 = vector.broadcast %36 : vector<152x1xf32> to vector<152x128xf32>
    %38 = arith.subf %34, %37 : vector<152x128xf32>
    %39 = math.exp %38 : vector<152x128xf32>
    %cst_19 = arith.constant dense<0.000000e+00> : vector<152xf32>
    %40 = vector.multi_reduction <add>, %39, %cst_19 [1] : vector<152x128xf32> to vector<152xf32>
    %41 = vector.shape_cast %40 : vector<152xf32> to vector<152x1xf32>
    %42 = math.log %41 : vector<152x1xf32>
    %43 = vector.broadcast %42 : vector<152x1xf32> to vector<152x128xf32>
    %44 = arith.subf %38, %43 : vector<152x128xf32>
    %45 = arith.truncf %44 : vector<152x128xf32> to vector<152x128xbf16>
    %c0_20 = arith.constant 0 : index
    %c0_21 = arith.constant 0 : index
    %46 = vector.load %arg7[%c0_20, %c0_21] : memref<152x128xbf16, #tpu.memory_space<vmem>>, vector<152x128xbf16>
    tpu.vector_store %arg7[%c0_20, %c0_21], %45 {strides = array<i32>} : memref<152x128xbf16, #tpu.memory_space<vmem>>, vector<152x128xbf16>,
    return
  }
  func.func @transform_0(%arg0: i32) -> (i32, i32) {
    %c0_i32 = arith.constant 0 : i32
    %c0_i32_0 = arith.constant 0 : i32
    return %arg0, %c0_i32 : i32, i32
  }
  func.func @transform_1(%arg0: i32) -> (i32, i32, i32) {
    %c0_i32 = arith.constant 0 : i32
    %c0_i32_0 = arith.constant 0 : i32
    %c0_i32_1 = arith.constant 0 : i32
    %c0_i32_2 = arith.constant 0 : i32
    return %c0_i32, %c0_i32_0, %c0_i32_1 : i32, i32, i32
  }
  func.func @transform_2(%arg0: i32) -> (i32, i32) {
    %c0_i32 = arith.constant 0 : i32
    %c0_i32_0 = arith.constant 0 : i32
    %c0_i32_1 = arith.constant 0 : i32
    return %c0_i32, %c0_i32_0 : i32, i32
  }
  func.func @transform_3(%arg0: i32) -> (i32, i32) {
    %c0_i32 = arith.constant 0 : i32
    %c0_i32_0 = arith.constant 0 : i32
    %c0_i32_1 = arith.constant 0 : i32
    return %c0_i32, %c0_i32_0 : i32, i32
  }
  func.func @transform_4(%arg0: i32) -> (i32, i32) {
    %c0_i32 = arith.constant 0 : i32
    %c0_i32_0 = arith.constant 0 : i32
    %c0_i32_1 = arith.constant 0 : i32
    return %c0_i32, %c0_i32_0 : i32, i32
  }
  func.func @transform_5(%arg0: i32) -> (i32, i32) {
    %c0_i32 = arith.constant 0 : i32
    %c0_i32_0 = arith.constant 0 : i32
    %c0_i32_1 = arith.constant 0 : i32
    return %c0_i32, %c0_i32_0 : i32, i32
  }
  func.func @transform_6(%arg0: i32) -> (i32, i32) {
    %c0_i32 = arith.constant 0 : i32
    %c0_i32_0 = arith.constant 0 : i32
    return %arg0, %c0_i32 : i32, i32
  }
}

</mosaic_0001>

<bundles_post_ra>
// kernel: net_forward.1
= control target key start
LH: loop header
LB: loop body
LE: loop exit
PB: predicated region body
PF: predicated region fallthrough
CT: control target
= control target key end

     0   :  { %11 = vsyncpa [#allocation3], 0  ;;  %s3980_s0 = inlined_call_operand.vmem [shape: s32[300,2], index: 0, kind: input, shape index: {}]   ;;  %s3981_s1 = inlined_call_operand.hbm [shape: bf16[2,128,128], index: 1, kind: input, shape index: {}]   ;;  %s3982_s2 = inlined_call_operand.vmem [shape: bf16[128,512], index: 2, kind: input, shape index: {}]   ;;  %s3983_s3 = inlined_call_operand.vmem [shape: f32[1,512], index: 3, kind: input, shape index: {}]   ;;  %s3984_s4 = inlined_call_operand.hbm [shape: bf16[512,128], index: 4, kind: input, shape index: {}]   ;;  %s3985_s5 = inlined_call_operand.vmem [shape: f32[1,128], index: 5, kind: input, shape index: {}]   ;;  %s3986_s6 = inlined_call_operand.hbm [shape: bf16[300,128], index: 6, kind: output, shape index: {}]  }
   0x1   :  { %12 = vsyncpa [#allocation6], 0 }
   0x2   :  { %13 = vsyncpa [#allocation4], 0 }
   0x3   :  { %15 = vsyncpa [#allocation4 + $0x1], 0  ;;  %s3334_s21 = smov 0   ;;  %s3336_s22 = smov 0  }
   0x4   :  { %s3338_s23 = smov 0   ;;  %s3340_s24 = smov 0  }
   0x5 LB: > { %s3355_s25 = sadd.s32 4294967295, %s3287_s24   ;;  %s2379_s26 = sadd.s32 4294967294, %s3287_s24   ;;  %s3287_s24 = sphi %s3340_s24, %s4000_s24   ;;  %s3283_s23 = sphi %s3338_s23, %s3999_s23   ;;  %s3279_s22 = sphi %s3336_s22, %s3998_s22   ;;  %s3275_s21 = sphi %s3334_s21, %s3997_s21  }
   0x6   : > { %s3359_s27 = sadd.s32 1, %s3287_s24   ;;  %s159_s28 = sadd.s32 1, %s3283_s23 }
   0x7   : > { %s156_s29 = ssub.s32 %s3287_s24, %s3359_s27  ;;  %p169_p0 = scmp.ne.s32.totalorder %s3283_s23, %s3279_s22 }
   0x8   : > { %p157_p1 = scmp.eq.s32.totalorder %s156_s29, 0  ;;  %p170_p2 = scmp.eq.s32.totalorder %s3355_s25, 1 }
   0x9   : > { %p175_p3 = scmp.ne.s32.totalorder %s3279_s22, %s3275_s21  ;;  %p176_p4 = scmp.eq.s32.totalorder %s2379_s26, 1 }
   0xa   : > { %s3370_s30 = scalar_select %p157_p1, %s3283_s23, %s159_s28  }
   0xb   : > { %p3372_p5 = por %p170_p2, %p169_p0  ;;  %p3376_p6 = por %p176_p4, %p175_p3 }
   0xc   : > { %p2380_p7 = scmp.ge.s32.totalorder %s3287_s24, 1  ;;  %p183_p8 = scmp.lt.s32.totalorder %s3287_s24, 3 }
   0xd   : > { %s3989_s8 = scalar_select %p3376_p6, 1, 0 }
   0xe   : > { %p3987_p9 = scmp.eq.s32.totalorder %s3355_s25, 0  ;;  %p3383_p10 = pnand %p2380_p7, %p183_p8 }
   0xf   : > { %s3289_s10 = smov [#allocation2]   ;;  %s3290_s13 = smov [#allocation5]  }
  0x10   : > { %s195_s11 = sshll.u32 %s3289_s10, 4  ;;  %p2913_p11 = pneg %p3383_p10  ;;  %s196_s11 = int_to_ptr.vmem [resolvable:$true] %s195_s11 }
  0x11   : > { %s214_s14 = sshll.u32 %s3290_s13, 4  ;;  %s3178_s15 = scalar_lea.vmem %s196_s11, 2048  ;;  %s215_s14 = int_to_ptr.vmem [resolvable:$true] %s214_s14 }
  0x12   : > { %p3391_p12 = pnand %p3987_p9, %p2913_p11  ;;  %p3179_p0 = scmp.ne.s32.totalorder %s196_s11, %s3178_s15 }
  0x13   : > { %p3186_p3 = scmp.lt.s32.totalorder %s196_s11, %s196_s11  ;;  %p3187_p4 = scmp.lt.s32.totalorder %s3178_s15, %s3178_s15 }
  0x14   : > { %p3169_p13 = pneg %p3391_p12 }
  0x15   : > { %p3188_p7 = por %p3187_p4, %p3186_p3 }
  0x16   : > { %p3181_p1 = pnand %p3179_p0, %p3169_p13 }
  0x18   : > { %p3182_p2 = pneg %p3181_p1 }
  0x1a   : > { %p3189_p8 = pnand %p3188_p7, %p3182_p2 }
  0x1c   : > { %3192 = shalt.err (!%p3189_p8)
}
  0x1d   : > { %s3291_s16 = smov 64   ;;  %s3292_s17 = smov 4  }
  0x1e   : > { %2916 = dma.hbm_to_vmem [thread:$0]  (!%p3391_p12), %s3981_s1, 2048, %s196_s11, [#allocation3], %s3291_s16, %s3291_s16, %s3292_s17  }
  0x1f   : > { %s3204_s20 = scalar_lea.vmem %s215_s14, 4096  ;;  %p3212_p9 = scmp.lt.s32.totalorder %s215_s14, %s215_s14 }
  0x20   : > { %p3205_p11 = scmp.ne.s32.totalorder %s215_s14, %s3204_s20  ;;  %p3213_p6 = scmp.lt.s32.totalorder %s3204_s20, %s3204_s20 }
  0x22   : > { %p3207_p0 = pnand %p3205_p11, %p3169_p13  ;;  %p3214_p3 = por %p3213_p6, %p3212_p9 }
  0x24   : > { %p3208_p1 = pneg %p3207_p0 }
  0x26   : > { %p3215_p2 = pnand %p3214_p3, %p3208_p1 }
  0x28   : > { %3218 = shalt.err (!%p3215_p2)
}
  0x29   : > { %2919 = dma.hbm_to_vmem [thread:$0]  (!%p3391_p12), %s3984_s4, 4096, %s215_s14, [#allocation6], %s3291_s16, %s3291_s16, %s3292_s17  }
  0x2a   : > { %242 = sbr.rel (%p3383_p10) target bundleno = 1235 (0x4d3), region = 44  ;;  %p3992_p4 = scmp.eq.s32.totalorder (!%p3383_p10), %s3355_s25, 0 }
  0x2f   : > { %3262 = dma.done.wait (%p3992_p4), [#allocation3], 2048   ;;  %p3993_p13 = pmov %p3992_p4 }
  0x30   : > { %p3994_p7 = pmov %p3992_p4 }
  0x31   : > { %3264 = vsyncadd (%p3993_p13), [#allocation3], 4294965248 }
  0x32   : > { %3266 = dma.done.wait (%p3994_p7), [#allocation6], 4096   ;;  %p3995_p6 = pmov %p3992_p4 }
  0x33   : > { %s276_s29 = smul.u32 19, %s3355_s25  ;;  %v3293_v0 = vmov 1   ;;  %v3294_v1 = vmov 0   ;;  %v2995_v2 = vld [vmem:[#allocation2 + $0x78] sm:$0xff]   ;;  %v2997_v8 = vld [vmem:[#allocation2 + $0x70] sm:$0xff]   ;;  %v2999_v10 = vld [vmem:[#allocation2 + $0x68] sm:$0xff]   ;;  %v303_v39 = vlaneseq }
  0x34   : > { %3268 = vsyncadd (%p3995_p6), [#allocation6], 4294963200  ;;  %2971 = vset.pattern.permute.xlu1 %v3293_v0  ;;  %2970 = vset.pattern.permute.xlu0 %v3294_v1  ;;  %v2996_v7 = vld [vmem:[#allocation2 + $0x38] sm:$0xff]   ;;  %v2998_v9 = vld [vmem:[#allocation2 + $0x30] sm:$0xff]   ;;  %v3295_v45 = vmov 1.0|1.0  }
  0x35   : > { %p277_p9 = scmp.lt.s32.totalorder %s276_s29, 37  ;;  %2830 = vmatprep.subr.bf16.mxu0 %v2995_v2  ;;  %2866 = vmatprep.subr.bf16.mxu1 %v2996_v7  ;;  %v3000_v11 = vld [vmem:[#allocation2 + $0x28] sm:$0xff]   ;;  %v3001_v12 = vld [vmem:[#allocation2 + $0x60] sm:$0xff]   ;;  %v3003_v16 = vld [vmem:[#allocation2 + $0x58] sm:$0xff]   ;;  %v3480_v42 = vand.u32 127, %v303_v39  ;;  %s273_s26 = sand.u32 1, %s3279_s22  }
  0x36   : > { %2831 = vmatpush3.bf16.msra.mxu0 %v2995_v2  ;;  %2867 = vmatpush3.bf16.msra.mxu1 %v2996_v7  ;;  %v3002_v15 = vld [vmem:[#allocation2 + $0x20] sm:$0xff]   ;;  %v3004_v18 = vld [vmem:[#allocation2 + $0x18] sm:$0xff]   ;;  %v3005_v19 = vld [vmem:[#allocation2 + $0x50] sm:$0xff]   ;;  %s2902_s28 = smul.u32 76, %s273_s26  ;;  %s3940_s14 = scalar_lea.sflag [#allocation4], %s273_s26 }
  0x37   : > { %s4002_s29 = smov (!%p277_p9, %s276_s29), 37  ;;  %2832 = vmatprep.subr.bf16.mxu0 %v2997_v8  ;;  %2868 = vmatprep.subr.bf16.mxu1 %v2998_v9  ;;  %v3006_v20 = vld [vmem:[#allocation2 + $0x10] sm:$0xff]   ;;  %v3007_v21 = vld [vmem:[#allocation2 + $0x48] sm:$0xff]   ;;  %v3009_v25 = vld [vmem:[#allocation2 + $0x40] sm:$0xff]   ;;  %s3296_s15 = smov [#allocation7]  }
  0x38   : > { %s2387_s9 = sshll.u32 %s4002_s29, 3  ;;  %v3008_v23 = vld [vmem:[#allocation2 + $0x8] sm:$0xff]   ;;  %v3010_v26 = vld [vmem:[#allocation2] sm:$0xff]   ;;  %s3900_s29 = scalar_lea.vmem [#allocation7], %s2902_s28 }
  0x39   : > { %s3429_s12 = scalar_lea.vmem %s3980_s0, %s2387_s9  ;;  %v3013_v37 = vld [vmem:[%s3982_s2 + $0xe4] ss:$16 sps:$4 sm:$0xff]   ;;  %v3016_v38 = vld [vmem:[%s3982_s2 + $0xec] ss:$16 sps:$4 sm:$0xff]   ;;  %v3011_v50 = vld [vmem:[%s3982_s2 + $0xe0] ss:$16 sps:$4 sm:$0xff]  }
  0x3a   : > { %v284_v3 = vld [vmem:[%s3429_s12] sm:$0xff]  ;;  %v285_v4 = vld [vmem:[%s3429_s12 + $0x8] sm:$0xff]  ;;  %v286_v5 = vld [vmem:[%s3429_s12 + $0x10] sm:$0xff]  ;;  %2833 = vmatpush3.bf16.msra.mxu0 %v2997_v8  ;;  %2869 = vmatpush3.bf16.msra.mxu1 %v2998_v9  ;;  %s2588_s9 = smul.u32 1216, %s3355_s25  ;;  %s2295_s10 = sshll.u32 %s3900_s29, 4  ;;  %s3930_s10 = int_to_ptr.vmem [resolvable:$true] %s2295_s10 }
  0x3b   : > { %446 = vperm.xlu1 %2971, %v284_v3   ;;  %306 = vperm.xlu0 %2970, %v284_v3   ;;  %v287_v6 = vld [vmem:[%s3429_s12 + $0x18] sm:$0xff]  ;;  %v288_v13 = vld [vmem:[%s3429_s12 + $0x20] sm:$0xff]  ;;  %v289_v14 = vld [vmem:[%s3429_s12 + $0x28] sm:$0xff]  ;;  %s3219_s25 = scalar_lea.vmem %s3930_s10, 1216  ;;  %s3223_s16 = sshll.u32 %s3296_s15, 4  ;;  %s3224_s16 = int_to_ptr.vmem [resolvable:$false] %s3223_s16 }
  0x3c   : > { %2834 = vmatprep.subr.bf16.mxu0 %v2999_v10  ;;  %2870 = vmatprep.subr.bf16.mxu1 %v3000_v11  ;;  %v290_v17 = vld [vmem:[%s3429_s12 + $0x30] sm:$0xff]  ;;  %v291_v24 = vld [vmem:[%s3429_s12 + $0x38] sm:$0xff]  ;;  %v293_v27 = vld [vmem:[%s3429_s12 + $0x48] sm:$0xff]  ;;  %s3935_s13 = scalar_lea.hbm %s3986_s6, %s2588_s9  ;;  %p3220_p10 = scmp.ne.s32.totalorder %s3930_s10, %s3219_s25 }
  0x3d   : > { %v294_v22 = vld [vmem:[%s3429_s12 + $0x50] sm:$0xff]  ;;  %v292_v28 = vld [vmem:[%s3429_s12 + $0x40] sm:$0xff]  ;;  %v297_v29 = vld [vmem:[%s3429_s12 + $0x68] sm:$0xff]  ;;  %s3225_s17 = scalar_lea.vmem %s3224_s16, 2432  ;;  %p3226_p11 = scmp.lt.s32.totalorder %s3930_s10, %s3224_s16 }
  0x3e   : > { %2835 = vmatpush3.bf16.msra.mxu0 %v2999_v10  ;;  %2871 = vmatpush3.bf16.msra.mxu1 %v3000_v11  ;;  %v298_v30 = vld [vmem:[%s3429_s12 + $0x70] sm:$0xff]  ;;  %v295_v31 = vld [vmem:[%s3429_s12 + $0x58] sm:$0xff]  ;;  %v301_v32 = vld [vmem:[%s3429_s12 + $0x88] sm:$0xff]  ;;  %p3221_p12 = pnand %p3220_p10, %p3372_p5  ;;  %p3227_p0 = scmp.lt.s32.totalorder %s3225_s17, %s3219_s25 }
  0x3f   : > { %449 = vperm.xlu1 %2971, %v285_v4   ;;  %2973 = vset.pattern.permute.xlu0 %v3293_v0  ;;  %v302_v33 = vld [vmem:[%s3429_s12 + $0x90] sm:$0xff]  ;;  %v296_v34 = vld [vmem:[%s3429_s12 + $0x60] sm:$0xff]  ;;  %v299_v35 = vld [vmem:[%s3429_s12 + $0x78] sm:$0xff] }
  0x40   : > { %452 = vperm.xlu0 %2973, %v286_v5   ;;  %2836 = vmatprep.subr.bf16.mxu0 %v3001_v12  ;;  %v300_v36 = vld [vmem:[%s3429_s12 + $0x80] sm:$0xff]  ;;  %v3014_v51 = vld [vmem:[%s3982_s2 + $0xe8] ss:$16 sps:$4 sm:$0xff]   ;;  %v3022_v53 = vld [vmem:[%s3982_s2 + $0xcc] ss:$16 sps:$4 sm:$0xff]   ;;  %p3222_p8 = pneg %p3221_p12  ;;  %p3228_p1 = por %p3227_p0, %p3226_p11 }
  0x41   : > { %2872 = vmatprep.subr.bf16.mxu1 %v3002_v15  ;;  %v3019_v52 = vld [vmem:[%s3982_s2 + $0xc4] ss:$16 sps:$4 sm:$0xff]   ;;  %v3017_v55 = vld [vmem:[%s3982_s2 + $0xc0] ss:$16 sps:$4 sm:$0xff]   ;;  %v3020_v57 = vld [vmem:[%s3982_s2 + $0xc8] ss:$16 sps:$4 sm:$0xff]  }
  0x42   : > { %2837 = vmatpush3.bf16.msra.mxu0 %v3001_v12  ;;  %2873 = vmatpush3.bf16.msra.mxu1 %v3002_v15  ;;  %v3025_v58 = vld [vmem:[%s3982_s2 + $0xa4] ss:$16 sps:$4 sm:$0xff]   ;;  %v3028_v59 = vld [vmem:[%s3982_s2 + $0xac] ss:$16 sps:$4 sm:$0xff]   ;;  %v3023_v61 = vld [vmem:[%s3982_s2 + $0xa0] ss:$16 sps:$4 sm:$0xff]   ;;  %p3229_p3 = pnand %p3228_p1, %p3222_p8 }
  0x43   : > { %2972 = vset.pattern.permute.xlu1 %v3294_v1  ;;  %2838 = vmatprep.subr.bf16.mxu0 %v3003_v16  ;;  %v3026_v62 = vld [vmem:[%s3982_s2 + $0xa8] ss:$16 sps:$4 sm:$0xff]   ;;  %v3031_v63 = vld [vmem:[%s3982_s2 + $0x84] ss:$16 sps:$4 sm:$0xff]   ;;  %v3034_v2 = vld [vmem:[%s3982_s2 + $0x8c] ss:$16 sps:$4 sm:$0xff]  }
  0x44   : > { %315 = vperm.xlu1 %2972, %v287_v6   ;;  %2974 = vset.pattern.permute.xlu0 %v3294_v1  ;;  %v3029_v3 = vld [vmem:[%s3982_s2 + $0x80] ss:$16 sps:$4 sm:$0xff]   ;;  %v3037_v7 = vld [vmem:[%s3982_s2 + $0x64] ss:$16 sps:$4 sm:$0xff]   ;;  %v3040_v8 = vld [vmem:[%s3982_s2 + $0x6c] ss:$16 sps:$4 sm:$0xff]  }
  0x45   : > { %309 = vperm.xlu0 %2974, %v285_v4   ;;  %2874 = vmatprep.subr.bf16.mxu1 %v3004_v18  ;;  %v3035_v9 = vld [vmem:[%s3982_s2 + $0x60] ss:$16 sps:$4 sm:$0xff]   ;;  %v3038_v10 = vld [vmem:[%s3982_s2 + $0x68] ss:$16 sps:$4 sm:$0xff]   ;;  %v3043_v11 = vld [vmem:[%s3982_s2 + $0x44] ss:$16 sps:$4 sm:$0xff]  }
  0x46   : > { %2839 = vmatpush3.bf16.msra.mxu0 %v3003_v16  ;;  %2875 = vmatpush3.bf16.msra.mxu1 %v3004_v18  ;;  %v3046_v12 = vld [vmem:[%s3982_s2 + $0x4c] ss:$16 sps:$4 sm:$0xff]   ;;  %v3041_v15 = vld [vmem:[%s3982_s2 + $0x40] ss:$16 sps:$4 sm:$0xff]   ;;  %v3044_v16 = vld [vmem:[%s3982_s2 + $0x48] ss:$16 sps:$4 sm:$0xff]  }
  0x47   : > { %2840 = vmatprep.subr.bf16.mxu0 %v3005_v19  ;;  %2876 = vmatprep.subr.bf16.mxu1 %v3006_v20 }
  0x48   : > { %2975 = vset.pattern.permute.xlu1 %v3293_v0 }
  0x49   : > { %455 = vperm.xlu1 %2975, %v287_v6   ;;  %312 = vperm.xlu0 %2974, %v286_v5   ;;  %v3032_v5 = vld [vmem:[%s3982_s2 + $0x88] ss:$16 sps:$4 sm:$0xff]  }
  0x4a   : > { %2841 = vmatpush3.bf16.msra.mxu0 %v3005_v19  ;;  %2877 = vmatpush3.bf16.msra.mxu1 %v3006_v20 }
  0x4b   : > { %2842 = vmatprep.subr.bf16.mxu0 %v3007_v21  ;;  %2878 = vmatprep.subr.bf16.mxu1 %v3008_v23 }
  0x4d   : > { %2976 = vset.pattern.permute.xlu1 %v3294_v1  ;;  %321 = vperm.xlu0 %2974, %v289_v14  }
  0x4e   : > { %318 = vperm.xlu1 %2976, %v288_v13   ;;  %2843 = vmatpush3.bf16.msra.mxu0 %v3007_v21 }
  0x4f   : > { %2844 = vmatprep.subr.bf16.mxu0 %v3009_v25  ;;  %2879 = vmatpush3.bf16.msra.mxu1 %v3008_v23 }
  0x50   : > { %2880 = vmatprep.subr.bf16.mxu1 %v3010_v26 }
  0x51   : > { %324 = vperm.xlu0 %2974, %v290_v17  }
  0x52   : > { %2977 = vset.pattern.permute.xlu1 %v3293_v0  ;;  %2845 = vmatpush3.bf16.msra.mxu0 %v3009_v25 }
  0x53   : > { %458 = vperm.xlu1 %2977, %v288_v13   ;;  %2881 = vmatpush3.bf16.msra.mxu1 %v3010_v26 }
  0x54   : > { %1130 = vmatprep.subr.bf16.mxu0 %v3013_v37  ;;  %1261 = vmatprep.subr.bf16.mxu1 %v3016_v38 }
  0x55   : > { %2979 = vset.pattern.permute.xlu0 %v3293_v0 }
  0x56   : > { %464 = vperm.xlu0 %2979, %v290_v17  }
  0x57   : > { %461 = vperm.xlu1 %2977, %v289_v14  }
  0x5a   : > { %476 = vperm.xlu0 %2979, %v294_v22  }
  0x5b   : > { %2978 = vset.pattern.permute.xlu1 %v3294_v1 }
  0x5c   : > { %327 = vperm.xlu1 %2978, %v291_v24  }
  0x5e   : > { %2984 = vset.pattern.permute.xlu0 %v3294_v1 }
  0x5f   : > { %333 = vperm.xlu0 %2984, %v293_v27  }
  0x60   : > { %2980 = vset.pattern.permute.xlu1 %v3293_v0 }
  0x61   : > { %467 = vperm.xlu1 %2980, %v291_v24  }
  0x63   : > { %336 = vperm.xlu0 %2984, %v294_v22  }
  0x65   : > { %2981 = vset.pattern.permute.xlu1 %v3294_v1 }
  0x66   : > { %330 = vperm.xlu1 %2981, %v292_v28  }
  0x67   : > { %345 = vperm.xlu0 %2984, %v297_v29  }
  0x6a   : > { %2982 = vset.pattern.permute.xlu1 %v3293_v0 }
  0x6b   : > { %470 = vperm.xlu1 %2982, %v292_v28   ;;  %348 = vperm.xlu0 %2984, %v298_v30  }
  0x6f   : > { %473 = vperm.xlu1 %2982, %v293_v27   ;;  %2989 = vset.pattern.permute.xlu0 %v3293_v0 }
  0x70   : > { %488 = vperm.xlu0 %2989, %v298_v30  }
  0x73   : > { %2983 = vset.pattern.permute.xlu1 %v3294_v1 }
  0x74   : > { %339 = vperm.xlu1 %2983, %v295_v31   ;;  %2992 = vset.pattern.permute.xlu0 %v3294_v1 }
  0x75   : > { %357 = vperm.xlu0 %2992, %v301_v32  }
  0x78   : > { %2985 = vset.pattern.permute.xlu1 %v3293_v0 }
  0x79   : > { %479 = vperm.xlu1 %2985, %v295_v31   ;;  %360 = vperm.xlu0 %2992, %v302_v33  }
  0x7d   : > { %2986 = vset.pattern.permute.xlu1 %v3294_v1  ;;  %2994 = vset.pattern.permute.xlu0 %v3293_v0 }
  0x7e   : > { %342 = vperm.xlu1 %2986, %v296_v34  }
  0x82   : > { %2987 = vset.pattern.permute.xlu1 %v3293_v0 }
  0x83   : > { %482 = vperm.xlu1 %2987, %v296_v34   ;;  %v3052_v34 = vld [vmem:[%s3982_s2 + $0x2c] ss:$16 sps:$4 sm:$0xff]  }
  0x87   : > { %485 = vperm.xlu1 %2987, %v297_v29  }
  0x8b   : > { %2988 = vset.pattern.permute.xlu1 %v3294_v1 }
  0x8c   : > { %351 = vperm.xlu1 %2988, %v299_v35  }
  0x90   : > { %2990 = vset.pattern.permute.xlu1 %v3293_v0 }
  0x91   : > { %491 = vperm.xlu1 %2990, %v299_v35   ;;  %v3047_v35 = vld [vmem:[%s3982_s2 + $0x20] ss:$16 sps:$4 sm:$0xff]  }
  0x95   : > { %2991 = vset.pattern.permute.xlu1 %v3294_v1 }
  0x96   : > { %354 = vperm.xlu1 %2991, %v300_v36  }
  0x9a   : > { %2993 = vset.pattern.permute.xlu1 %v3293_v0 }
  0x9b   : > { %494 = vperm.xlu1 %2993, %v300_v36   ;;  %v3050_v36 = vld [vmem:[%s3982_s2 + $0x28] ss:$16 sps:$4 sm:$0xff]  }
  0x9f   : > { %497 = vperm.xlu1 %2993, %v301_v32  }
  0xa3   : > { %500 = vperm.xlu1 %2993, %v302_v33   ;;  %v3049_v33 = vld [vmem:[%s3982_s2 + $0x24] ss:$16 sps:$4 sm:$0xff]  }
  0xb6   : > { %v447_v40 = vpop.permute.xlu1 %446  ;;  %v307_v41 = vpop.permute.xlu0 %306 }
  0xb7   : > { %vm502_vm0 = vcmp.eq.s32.totalorder %v3480_v42, %v447_v40  ;;  %vm362_vm3 = vcmp.eq.s32.totalorder %v3480_v42, %v307_v41  ;;  %v3055_v40 = vld [vmem:[%s3982_s2 + $0x4] ss:$16 sps:$4 sm:$0xff]   ;;  %v3058_v41 = vld [vmem:[%s3982_s2 + $0xc] ss:$16 sps:$4 sm:$0xff]  }
  0xba   : > { %v450_v43 = vpop.permute.xlu1 %449 }
  0xbb   : > { %vm503_vm1 = vcmp.eq.s32.totalorder %v3480_v42, %v450_v43  ;;  %v453_v44 = vpop.permute.xlu0 %452  ;;  %v3053_v43 = vld [vmem:[%s3982_s2] ss:$16 sps:$4 sm:$0xff]  }
  0xbc   : > { %vm2434_vm2 = vmpackc.low %vm503_vm1, %vm502_vm0  ;;  %vm504_vm6 = vcmp.eq.s32.totalorder %v3480_v42, %v453_v44  ;;  %v3056_v44 = vld [vmem:[%s3982_s2 + $0x8] ss:$16 sps:$4 sm:$0xff]  }
  0xbd   : > { %2846 = vmatprep.mubr.msk.bf16.mxu0 %vm2434_vm2, %v3295_v45 }
  0xbf   : > { %v316_v46 = vpop.permute.xlu1 %315 }
  0xc0   : > { %v310_v47 = vpop.permute.xlu0 %309  ;;  %vm365_vm9 = vcmp.eq.s32.totalorder %v3480_v42, %v316_v46 }
  0xc1   : > { %vm363_vm4 = vcmp.eq.s32.totalorder %v3480_v42, %v310_v47 }
  0xc2   : > { %vm2462_vm5 = vmpackc.low %vm363_vm4, %vm362_vm3 }
  0xc3   : > { %2882 = vmatprep.mubr.msk.bf16.mxu1 %vm2462_vm5, %v3295_v45 }
  0xc4   : > { %v456_v48 = vpop.permute.xlu1 %455  ;;  %v313_v49 = vpop.permute.xlu0 %312 }
  0xc5   : > { %vm505_vm7 = vcmp.eq.s32.totalorder %v3480_v42, %v456_v48  ;;  %vm364_vm8 = vcmp.eq.s32.totalorder %v3480_v42, %v313_v49 }
  0xc6   : > { %vm2436_vm10 = vmpackc.low %vm505_vm7, %vm504_vm6 }
  0xc7   : > { %vm2464_vm11 = vmpackc.low %vm365_vm9, %vm364_vm8  ;;  %2847 = vmatmul.mubr.msk.bf16.vlgmr.msra.gmra.mxu0 %vm2436_vm10, %v3295_v45 }
  0xc8   : > { %2883 = vmatmul.mubr.msk.bf16.vlgmr.msra.gmra.mxu1 %vm2464_vm11, %v3295_v45  ;;  %v322_v54 = vpop.permute.xlu0 %321  ;;  %1131 = vmatpush1.bf16.msra.mxu0 %v3011_v50  ;;  %v3059_v50 = vld [vmem:[#allocation5 + $0x78] sm:$0xff]  }
  0xc9   : > { %v319_v56 = vpop.permute.xlu1 %318  ;;  %vm367_vm12 = vcmp.eq.s32.totalorder %v3480_v42, %v322_v54  ;;  %1262 = vmatpush1.bf16.msra.mxu1 %v3014_v51  ;;  %1132 = vmatprep.subr.bf16.mxu0 %v3019_v52  ;;  %v3061_v51 = vld [vmem:[#allocation5 + $0xf8] sm:$0xff]  }
  0xca   : > { %vm366_vm13 = vcmp.eq.s32.totalorder %v3480_v42, %v319_v56  ;;  %1263 = vmatprep.subr.bf16.mxu1 %v3022_v53 }
  0xcb   : > { %vm2466_vm14 = vmpackc.low %vm367_vm12, %vm366_vm13 }
  0xcc   : > { %2886 = vmatprep.mubr.msk.bf16.mxu1 %vm2466_vm14, %v3295_v45  ;;  %v325_v60 = vpop.permute.xlu0 %324  ;;  %1133 = vmatpush1.bf16.msra.mxu0 %v3017_v55 }
  0xcd   : > { %1264 = vmatpush1.bf16.msra.mxu1 %v3020_v57  ;;  %1134 = vmatprep.subr.bf16.mxu0 %v3025_v58  ;;  %vm368_vm2 = vcmp.eq.s32.totalorder %v3480_v42, %v325_v60 }
  0xce   : > { %v459_v0 = vpop.permute.xlu1 %458  ;;  %1265 = vmatprep.subr.bf16.mxu1 %v3028_v59 }
  0xcf   : > { %vm506_vm15 = vcmp.eq.s32.totalorder %v3480_v42, %v459_v0  ;;  %v3065_v0 = vld [vmem:[#allocation5 + $0xf0] sm:$0xff]  }
  0xd0   : > { %1135 = vmatpush1.bf16.msra.mxu0 %v3023_v61 }
  0xd1   : > { %v465_v4 = vpop.permute.xlu0 %464  ;;  %1266 = vmatpush1.bf16.msra.mxu1 %v3026_v62  ;;  %1136 = vmatprep.subr.bf16.mxu0 %v3031_v63  ;;  %v3060_v62 = vld [vmem:[#allocation5 + $0x38] sm:$0xff]  }
  0xd2   : > { %v462_v6 = vpop.permute.xlu1 %461  ;;  %1267 = vmatprep.subr.bf16.mxu1 %v3034_v2  ;;  %vm508_vm5 = vcmp.eq.s32.totalorder %v3480_v42, %v465_v4  ;;  %v3062_v63 = vld [vmem:[#allocation5 + $0xb8] sm:$0xff]   ;;  %v3066_v4 = vld [vmem:[#allocation5 + $0xb0] sm:$0xff]  }
  0xd3   : > { %vm507_vm0 = vcmp.eq.s32.totalorder %v3480_v42, %v462_v6  ;;  %v3069_v6 = vld [vmem:[#allocation5 + $0xe8] sm:$0xff]  }
  0xd4   : > { %vm2438_vm1 = vmpackc.low %vm507_vm0, %vm506_vm15  ;;  %1137 = vmatpush1.bf16.msra.mxu0 %v3029_v3  ;;  %v3064_v3 = vld [vmem:[#allocation5 + $0x30] sm:$0xff]  }
  0xd5   : > { %2850 = vmatprep.mubr.msk.bf16.mxu0 %vm2438_vm1, %v3295_v45  ;;  %1268 = vmatpush1.bf16.msra.mxu1 %v3032_v5  ;;  %v477_v14 = vpop.permute.xlu0 %476  ;;  %v3067_v5 = vld [vmem:[#allocation5 + $0x68] sm:$0xff]  }
  0xd6   : > { %1138 = vmatprep.subr.bf16.mxu0 %v3037_v7  ;;  %1269 = vmatprep.subr.bf16.mxu1 %v3040_v8  ;;  %vm512_vm1 = vcmp.eq.s32.totalorder %v3480_v42, %v477_v14 }
  0xd7   : > { %v328_v13 = vpop.permute.xlu1 %327 }
  0xd8   : > { %vm369_vm3 = vcmp.eq.s32.totalorder %v3480_v42, %v328_v13  ;;  %1139 = vmatpush1.bf16.msra.mxu0 %v3035_v9  ;;  %v3068_v9 = vld [vmem:[#allocation5 + $0x28] sm:$0xff]   ;;  %v3073_v13 = vld [vmem:[#allocation5 + $0xe0] sm:$0xff]  }
  0xd9   : > { %vm2468_vm4 = vmpackc.low %vm369_vm3, %vm368_vm2  ;;  %1270 = vmatpush1.bf16.msra.mxu1 %v3038_v10  ;;  %1140 = vmatprep.subr.bf16.mxu0 %v3043_v11  ;;  %v3070_v10 = vld [vmem:[#allocation5 + $0xa8] sm:$0xff]  }
  0xda   : > { %2887 = vmatmul.mubr.msk.bf16.gmra.mxu1 %vm2468_vm4, %v3295_v45  ;;  %1271 = vmatprep.subr.bf16.mxu1 %v3046_v12  ;;  %v334_v18 = vpop.permute.xlu0 %333  ;;  %v3071_v12 = vld [vmem:[#allocation5 + $0x60] sm:$0xff]  }
  0xdb   : > { %vm371_vm8 = vcmp.eq.s32.totalorder %v3480_v42, %v334_v18  ;;  %v3076_v18 = vld [vmem:[#allocation5 + $0xd8] sm:$0xff]  }
  0xdc   : > { %v468_v17 = vpop.permute.xlu1 %467  ;;  %1141 = vmatpush1.bf16.msra.mxu0 %v3041_v15  ;;  %v3072_v15 = vld [vmem:[#allocation5 + $0x20] sm:$0xff]  }
  0xdd   : > { %vm509_vm6 = vcmp.eq.s32.totalorder %v3480_v42, %v468_v17  ;;  %1272 = vmatpush1.bf16.msra.mxu1 %v3044_v16  ;;  %1142 = vmatprep.subr.bf16.mxu0 %v3049_v33  ;;  %v3074_v16 = vld [vmem:[#allocation5 + $0xa0] sm:$0xff]   ;;  %v3075_v17 = vld [vmem:[#allocation5 + $0x58] sm:$0xff]  }
  0xde   : > { %vm2440_vm7 = vmpackc.low %vm509_vm6, %vm508_vm5  ;;  %v337_v22 = vpop.permute.xlu0 %336  ;;  %1273 = vmatprep.subr.bf16.mxu1 %v3052_v34 }
  0xdf   : > { %2851 = vmatmul.mubr.msk.bf16.gmra.mxu0 %vm2440_vm7, %v3295_v45  ;;  %vm372_vm14 = vcmp.eq.s32.totalorder %v3480_v42, %v337_v22  ;;  %v3077_v22 = vld [vmem:[#allocation5 + $0x18] sm:$0xff]  }
  0xe0   : > { %1143 = vmatpush1.bf16.msra.mxu0 %v3047_v35 }
  0xe1   : > { %v331_v19 = vpop.permute.xlu1 %330  ;;  %1274 = vmatpush1.bf16.msra.mxu1 %v3050_v36  ;;  %1144 = vmatprep.subr.bf16.mxu0 %v3055_v40 }
  0xe2   : > { %vm370_vm9 = vcmp.eq.s32.totalorder %v3480_v42, %v331_v19  ;;  %v346_v25 = vpop.permute.xlu0 %345  ;;  %1275 = vmatprep.subr.bf16.mxu1 %v3058_v41 }
  0xe3   : > { %vm2470_vm10 = vmpackc.low %vm371_vm8, %vm370_vm9  ;;  %vm375_vm4 = vcmp.eq.s32.totalorder %v3480_v42, %v346_v25 }
  0xe4   : > { %2890 = vmatprep.mubr.msk.bf16.mxu1 %vm2470_vm10, %v3295_v45  ;;  %1145 = vmatpush1.bf16.msra.mxu0 %v3053_v43 }
  0xe5   : > { %1276 = vmatpush1.bf16.msra.mxu1 %v3056_v44  ;;  %2678 = vmatprep.subr.bf16.mxu0 %v3059_v50 }
  0xe6   : > { %v471_v20 = vpop.permute.xlu1 %470  ;;  %v349_v27 = vpop.permute.xlu0 %348  ;;  %2754 = vmatprep.subr.bf16.mxu1 %v3061_v51 }
  0xe7   : > { %vm510_vm11 = vcmp.eq.s32.totalorder %v3480_v42, %v471_v20  ;;  %vm376_vm10 = vcmp.eq.s32.totalorder %v3480_v42, %v349_v27 }
  0xea   : > { %v474_v21 = vpop.permute.xlu1 %473 }
  0xeb   : > { %vm511_vm12 = vcmp.eq.s32.totalorder %v3480_v42, %v474_v21  ;;  %v489_v29 = vpop.permute.xlu0 %488 }
  0xec   : > { %vm2442_vm13 = vmpackc.low %vm511_vm12, %vm510_vm11 }
  0xed   : > { %2854 = vmatprep.mubr.msk.bf16.mxu0 %vm2442_vm13, %v3295_v45  ;;  %vm516_vm13 = vcmp.eq.s32.totalorder %v3480_v42, %v489_v29 }
  0xef   : > { %v340_v23 = vpop.permute.xlu1 %339 }
  0xf0   : > { %vm373_vm15 = vcmp.eq.s32.totalorder %v3480_v42, %v340_v23  ;;  %v358_v31 = vpop.permute.xlu0 %357  ;;  %v3078_v23 = vld [vmem:[#allocation5 + $0x98] sm:$0xff]  }
  0xf1   : > { %vm2472_vm0 = vmpackc.low %vm373_vm15, %vm372_vm14 }
  0xf2   : > { %2891 = vmatmul.mubr.msk.bf16.gmra.mxu1 %vm2472_vm0, %v3295_v45 }
  0xf4   : > { %v480_v24 = vpop.permute.xlu1 %479  ;;  %v361_v38 = vpop.permute.xlu0 %360 }
  0xf5   : > { %vm513_vm2 = vcmp.eq.s32.totalorder %v3480_v42, %v480_v24  ;;  %vm380_vm0 = vcmp.eq.s32.totalorder %v3480_v42, %v361_v38 }
  0xf6   : > { %vm2444_vm3 = vmpackc.low %vm513_vm2, %vm512_vm1  ;;  %vm379_vm1 = vcmp.eq.s32.totalorder %v3480_v42, %v358_v31 }
  0xf7   : > { %2855 = vmatmul.mubr.msk.bf16.gmra.mxu0 %vm2444_vm3, %v3295_v45  ;;  %vm2480_vm3 = vmpackc.low %vm380_vm0, %vm380_vm0 }
  0xf9   : > { %v343_v26 = vpop.permute.xlu1 %342 }
  0xfa   : > { %vm374_vm5 = vcmp.eq.s32.totalorder %v3480_v42, %v343_v26 }
  0xfb   : > { %vm2474_vm6 = vmpackc.low %vm375_vm4, %vm374_vm5 }
  0xfc   : > { %2894 = vmatprep.mubr.msk.bf16.mxu1 %vm2474_vm6, %v3295_v45 }
  0xfe   : > { %v483_v28 = vpop.permute.xlu1 %482 }
  0xff   : > { %vm514_vm7 = vcmp.eq.s32.totalorder %v3480_v42, %v483_v28 }
 0x102   : > { %v486_v30 = vpop.permute.xlu1 %485 }
 0x103   : > { %vm515_vm8 = vcmp.eq.s32.totalorder %v3480_v42, %v486_v30 }
 0x104   : > { %vm2446_vm9 = vmpackc.low %vm515_vm8, %vm514_vm7 }
 0x105   : > { %2858 = vmatprep.mubr.msk.bf16.mxu0 %vm2446_vm9, %v3295_v45 }
 0x107   : > { %v352_v32 = vpop.permute.xlu1 %351 }
 0x108   : > { %vm377_vm11 = vcmp.eq.s32.totalorder %v3480_v42, %v352_v32 }
 0x109   : > { %vm2476_vm12 = vmpackc.low %vm377_vm11, %vm376_vm10 }
 0x10a   : > { %2895 = vmatmul.mubr.msk.bf16.gmra.mxu1 %vm2476_vm12, %v3295_v45 }
 0x10c   : > { %v492_v37 = vpop.permute.xlu1 %491 }
 0x10d   : > { %vm517_vm14 = vcmp.eq.s32.totalorder %v3480_v42, %v492_v37 }
 0x10e   : > { %vm2448_vm15 = vmpackc.low %vm517_vm14, %vm516_vm13 }
 0x10f   : > { %2859 = vmatmul.mubr.msk.bf16.gmra.mxu0 %vm2448_vm15, %v3295_v45 }
 0x111   : > { %v355_v46 = vpop.permute.xlu1 %354 }
 0x112   : > { %vm378_vm2 = vcmp.eq.s32.totalorder %v3480_v42, %v355_v46 }
 0x113   : > { %vm2478_vm4 = vmpackc.low %vm379_vm1, %vm378_vm2 }
 0x114   : > { %2898 = vmatprep.mubr.msk.bf16.mxu1 %vm2478_vm4, %v3295_v45 }
 0x115   : > { %2899 = vmatmul.mubr.msk.bf16.gmra.mxu1 %vm2480_vm3, %v3295_v45 }
 0x116   : > { %v495_v47 = vpop.permute.xlu1 %494  ;;  %1293 = vmatprep.mubr.bf16.mxu1 %v3294_v1 }
 0x117   : > { %vm518_vm5 = vcmp.eq.s32.totalorder %v3480_v42, %v495_v47 }
 0x11a   : > { %v498_v48 = vpop.permute.xlu1 %497 }
 0x11b   : > { %vm519_vm6 = vcmp.eq.s32.totalorder %v3480_v42, %v498_v48 }
 0x11c   : > { %vm2450_vm7 = vmpackc.low %vm519_vm6, %vm518_vm5 }
 0x11d   : > { %2862 = vmatprep.mubr.msk.bf16.mxu0 %vm2450_vm7, %v3295_v45 }
 0x11e   : > { %v501_v49 = vpop.permute.xlu1 %500 }
 0x11f   : > { %vm520_vm8 = vcmp.eq.s32.totalorder %v3480_v42, %v501_v49 }
 0x120   : > { %vm2452_vm9 = vmpackc.low %vm520_vm8, %vm520_vm8 }
 0x121   : > { %2863 = vmatmul.mubr.msk.bf16.gmra.mxu0 %vm2452_vm9, %v3295_v45  ;;  %v3063_v45 = vld [vmem:[#allocation5 + $0x70] sm:$0xff]  }
 0x122   : > { %1162 = vmatprep.mubr.bf16.mxu0 %v3294_v1 }
 0x187   : > { %v2848_v52 = vpop.f32.mrf.mxu0 }
 0x188   : > { %v2884_v53 = vpop.f32.mrf.mxu1 }
 0x189   : > { %v668_v54 = vpop.f32.mrf.mxu0  ;;  %v837_v7 = vadd.f32 %v2884_v53, %v2848_v52 }
 0x18a   : > { %v828_v55 = vpop.f32.mrf.mxu1 }
 0x18b   : > { %v2849_v56 = vpop.f32.mrf.mxu0  ;;  %v829_v60 = vadd.f32 %v828_v55, %v668_v54 }
 0x18c   : > { %v2885_v57 = vpop.f32.mrf.mxu1 }
 0x18d   : > { %v671_v58 = vpop.f32.mrf.mxu0  ;;  %v840_v2 = vadd.f32 %v2885_v57, %v2849_v56  ;;  %v3079_v57 = vld [vmem:[#allocation5 + $0x50] sm:$0xff]  }
 0x18e   : > { %v831_v59 = vpop.f32.mrf.mxu1 }
 0x18f   : > { %v832_v61 = vadd.f32 %v831_v59, %v671_v58  ;;  %v907_v8 = vpack.c.bf16 %v840_v2, %v837_v7  ;;  %v3080_v58 = vld [vmem:[#allocation5 + $0xd0] sm:$0xff]   ;;  %v3084_v2 = vld [vmem:[#allocation5 + $0xc8] sm:$0xff]  }
 0x190   : > { %v3081_v59 = vld [vmem:[#allocation5 + $0x10] sm:$0xff]  }
 0x191   : > { %v906_v42 = vpack.c.bf16 %v832_v61, %v829_v60  ;;  %v3082_v60 = vld [vmem:[#allocation5 + $0x90] sm:$0xff]  }
 0x193   : > { %1163 = vmatmul.mubr.bf16.vlgmr.msra.gmra.mxu0 %v906_v42  ;;  %1294 = vmatmul.mubr.bf16.vlgmr.msra.gmra.mxu1 %v906_v42 }
 0x194   : > { %1172 = vmatprep.mubr.bf16.mxu0 %v3294_v1  ;;  %1303 = vmatprep.mubr.bf16.mxu1 %v3294_v1 }
 0x195   : > { %2679 = vmatpush3.bf16.msra.mxu0 %v3060_v62  ;;  %2755 = vmatpush3.bf16.msra.mxu1 %v3062_v63 }
 0x196   : > { %2680 = vmatprep.subr.bf16.mxu0 %v3063_v45  ;;  %2756 = vmatprep.subr.bf16.mxu1 %v3065_v0  ;;  %v3083_v0 = vld [vmem:[#allocation5 + $0x48] sm:$0xff]  }
 0x199   : > { %2681 = vmatpush3.bf16.msra.mxu0 %v3064_v3  ;;  %2757 = vmatpush3.bf16.msra.mxu1 %v3066_v4  ;;  %v3085_v4 = vld [vmem:[#allocation5 + $0x8] sm:$0xff]  }
 0x19a   : > { %v2888_v11 = vpop.f32.mrf.mxu1  ;;  %2682 = vmatprep.subr.bf16.mxu0 %v3067_v5  ;;  %2758 = vmatprep.subr.bf16.mxu1 %v3069_v6  ;;  %v3086_v5 = vld [vmem:[#allocation5 + $0x88] sm:$0xff]  }
 0x19b   : > { %1173 = vmatmul.mubr.bf16.gmra.mxu0 %v907_v8  ;;  %1304 = vmatmul.mubr.bf16.gmra.mxu1 %v907_v8  ;;  %v3087_v8 = vld [vmem:[#allocation5 + $0x40] sm:$0xff]  }
 0x19c   : > { %1182 = vmatprep.mubr.bf16.mxu0 %v3294_v1  ;;  %1313 = vmatprep.mubr.bf16.mxu1 %v3294_v1  ;;  %v844_v14 = vpop.f32.mrf.mxu1 }
 0x19d   : > { %2683 = vmatpush3.bf16.msra.mxu0 %v3068_v9  ;;  %2759 = vmatpush3.bf16.msra.mxu1 %v3070_v10  ;;  %v3088_v9 = vld [vmem:[#allocation5 + $0xc0] sm:$0xff]  }
 0x19e   : > { %2684 = vmatprep.subr.bf16.mxu0 %v3071_v12  ;;  %2760 = vmatprep.subr.bf16.mxu1 %v3073_v13  ;;  %v2889_v20 = vpop.f32.mrf.mxu1  ;;  %v3089_v10 = vld [vmem:[#allocation5] sm:$0xff]  }
 0x19f   : > { %v2852_v19 = vpop.f32.mrf.mxu0 }
 0x1a0   : > { %v847_v25 = vpop.f32.mrf.mxu1  ;;  %v853_v31 = vadd.f32 %v2888_v11, %v2852_v19  ;;  %v3090_v11 = vld [vmem:[#allocation5 + $0x80] sm:$0xff]  }
 0x1a1   : > { %v684_v21 = vpop.f32.mrf.mxu0  ;;  %2685 = vmatpush3.bf16.msra.mxu0 %v3072_v15  ;;  %2761 = vmatpush3.bf16.msra.mxu1 %v3074_v16 }
 0x1a2   : > { %2686 = vmatprep.subr.bf16.mxu0 %v3075_v17  ;;  %2762 = vmatprep.subr.bf16.mxu1 %v3076_v18  ;;  %v845_v27 = vadd.f32 %v844_v14, %v684_v21 }
 0x1a3   : > { %v2853_v24 = vpop.f32.mrf.mxu0 }
 0x1a4   : > { %v856_v30 = vadd.f32 %v2889_v20, %v2853_v24  ;;  %v951_v24 = vshrl.u32 %v303_v39, 7 }
 0x1a5   : > { %v687_v26 = vpop.f32.mrf.mxu0  ;;  %2687 = vmatpush3.bf16.msra.mxu0 %v3077_v22  ;;  %2763 = vmatpush3.bf16.msra.mxu1 %v3078_v23 }
 0x1a6   : > { %v848_v28 = vadd.f32 %v847_v25, %v687_v26  ;;  %v909_v32 = vpack.c.bf16 %v856_v30, %v853_v31  ;;  %2688 = vmatprep.subr.bf16.mxu0 %v3079_v57  ;;  %2764 = vmatprep.subr.bf16.mxu1 %v3080_v58  ;;  %v956_v25 = vsub.s32 1, %v951_v24  ;;  %v964_v26 = vsub.s32 3, %v951_v24 }
 0x1a8   : > { %v908_v29 = vpack.c.bf16 %v848_v28, %v845_v27  ;;  %v952_v27 = vsub.s32 0, %v951_v24  ;;  %v960_v28 = vsub.s32 2, %v951_v24 }
 0x1a9   : > { %2689 = vmatpush3.bf16.msra.mxu0 %v3081_v59  ;;  %2765 = vmatpush3.bf16.msra.mxu1 %v3082_v60 }
 0x1aa   : > { %1183 = vmatmul.mubr.bf16.gmra.mxu0 %v908_v29  ;;  %1314 = vmatmul.mubr.bf16.gmra.mxu1 %v908_v29  ;;  %v948_v29 = vld [vmem:[%s3983_s3] sm:$0xf] }
 0x1ab   : > { %1192 = vmatprep.mubr.bf16.mxu0 %v3294_v1  ;;  %1323 = vmatprep.mubr.bf16.mxu1 %v3294_v1 }
 0x1ac   : > { %2690 = vmatprep.subr.bf16.mxu0 %v3083_v0  ;;  %2766 = vmatprep.subr.bf16.mxu1 %v3084_v2 }
 0x1ad   : > { %2691 = vmatpush3.bf16.msra.mxu0 %v3085_v4  ;;  %2767 = vmatpush3.bf16.msra.mxu1 %v3086_v5 }
 0x1ae   : > { %2692 = vmatprep.subr.bf16.mxu0 %v3087_v8  ;;  %2768 = vmatprep.subr.bf16.mxu1 %v3088_v9 }
 0x1b1   : > { %2693 = vmatpush3.bf16.msra.mxu0 %v3089_v10  ;;  %2769 = vmatpush3.bf16.msra.mxu1 %v3090_v11 }
 0x1b2   : > { %v2892_v33 = vpop.f32.mrf.mxu1  ;;  %1193 = vmatmul.mubr.bf16.gmra.mxu0 %v909_v32  ;;  %1324 = vmatmul.mubr.bf16.gmra.mxu1 %v909_v32  ;;  %v3654_v32 = vrot.slane %v948_v29, %v956_v25 }
 0x1b3   : > { %1202 = vmatprep.mubr.bf16.mxu0 %v3294_v1  ;;  %1333 = vmatprep.mubr.bf16.mxu1 %v3294_v1 }
 0x1b4   : > { %v860_v34 = vpop.f32.mrf.mxu1 }
 0x1b6   : > { %v2893_v36 = vpop.f32.mrf.mxu1 }
 0x1b7   : > { %v2856_v35 = vpop.f32.mrf.mxu0 }
 0x1b8   : > { %v863_v40 = vpop.f32.mrf.mxu1  ;;  %v869_v48 = vadd.f32 %v2892_v33, %v2856_v35  ;;  %v3656_v33 = vrot.slane %v948_v29, %v964_v26 }
 0x1b9   : > { %v700_v37 = vpop.f32.mrf.mxu0 }
 0x1ba   : > { %v861_v43 = vadd.f32 %v860_v34, %v700_v37  ;;  %v3660_v34 = vrot.slane %v948_v29, %v960_v28 }
 0x1bb   : > { %v2857_v38 = vpop.f32.mrf.mxu0 }
 0x1bc   : > { %v872_v47 = vadd.f32 %v2893_v36, %v2857_v38 }
 0x1bd   : > { %v703_v41 = vpop.f32.mrf.mxu0 }
 0x1be   : > { %v864_v44 = vadd.f32 %v863_v40, %v703_v41  ;;  %v911_v49 = vpack.c.bf16 %v872_v47, %v869_v48 }
 0x1c0   : > { %v910_v46 = vpack.c.bf16 %v864_v44, %v861_v43 }
 0x1c2   : > { %1203 = vmatmul.mubr.bf16.gmra.mxu0 %v910_v46  ;;  %1334 = vmatmul.mubr.bf16.gmra.mxu1 %v910_v46 }
 0x1c3   : > { %1212 = vmatprep.mubr.bf16.mxu0 %v3294_v1  ;;  %1343 = vmatprep.mubr.bf16.mxu1 %v3294_v1 }
 0x1ca   : > { %v2896_v50 = vpop.f32.mrf.mxu1  ;;  %1213 = vmatmul.mubr.bf16.gmra.mxu0 %v911_v49  ;;  %1344 = vmatmul.mubr.bf16.gmra.mxu1 %v911_v49 }
 0x1cb   : > { %1222 = vmatprep.mubr.bf16.mxu0 %v3294_v1  ;;  %1353 = vmatprep.mubr.bf16.mxu1 %v3294_v1 }
 0x1cc   : > { %v876_v51 = vpop.f32.mrf.mxu1 }
 0x1ce   : > { %v2897_v52 = vpop.f32.mrf.mxu1 }
 0x1cf   : > { %v2860_v53 = vpop.f32.mrf.mxu0 }
 0x1d0   : > { %v879_v55 = vpop.f32.mrf.mxu1  ;;  %v885_v12 = vadd.f32 %v2896_v50, %v2860_v53 }
 0x1d1   : > { %v716_v54 = vpop.f32.mrf.mxu0 }
 0x1d2   : > { %v877_v62 = vadd.f32 %v876_v51, %v716_v54 }
 0x1d3   : > { %v2861_v56 = vpop.f32.mrf.mxu0 }
 0x1d4   : > { %v888_v7 = vadd.f32 %v2897_v52, %v2861_v56 }
 0x1d5   : > { %v719_v61 = vpop.f32.mrf.mxu0  ;;  %v2900_v42 = vpop.f32.mrf.mxu1 }
 0x1d6   : > { %v880_v63 = vadd.f32 %v879_v55, %v719_v61  ;;  %v913_v13 = vpack.c.bf16 %v888_v7, %v885_v12 }
 0x1d7   : > { %v892_v45 = vpop.f32.mrf.mxu1 }
 0x1d8   : > { %v912_v3 = vpack.c.bf16 %v880_v63, %v877_v62 }
 0x1d9   : > { %v2901_v6 = vpop.f32.mrf.mxu1 }
 0x1da   : > { %1223 = vmatmul.mubr.bf16.gmra.mxu0 %v912_v3  ;;  %1354 = vmatmul.mubr.bf16.gmra.mxu1 %v912_v3 }
 0x1db   : > { %1232 = vmatprep.mubr.bf16.mxu0 %v3294_v1  ;;  %1363 = vmatprep.mubr.bf16.mxu1 %v3294_v1  ;;  %v895_v17 = vpop.f32.mrf.mxu1 }
 0x1e1   : > { %v2864_v14 = vpop.f32.mrf.mxu0 }
 0x1e2   : > { %1233 = vmatmul.mubr.bf16.gmra.mxu0 %v913_v13  ;;  %1364 = vmatmul.mubr.bf16.gmra.mxu1 %v913_v13  ;;  %v901_v22 = vadd.f32 %v2900_v42, %v2864_v14 }
 0x1e3   : > { %v732_v15 = vpop.f32.mrf.mxu0  ;;  %1242 = vmatprep.mubr.bf16.mxu0 %v3294_v1  ;;  %1373 = vmatprep.mubr.bf16.mxu1 %v3294_v1 }
 0x1e4   : > { %v893_v19 = vadd.f32 %v892_v45, %v732_v15  ;;  %v915_v23 = vpack.c.bf16 %v901_v22, %v901_v22 }
 0x1e5   : > { %v2865_v16 = vpop.f32.mrf.mxu0 }
 0x1e7   : > { %v735_v18 = vpop.f32.mrf.mxu0 }
 0x1e8   : > { %v896_v20 = vadd.f32 %v895_v17, %v735_v18 }
 0x1ea   : > { %v914_v21 = vpack.c.bf16 %v896_v20, %v893_v19 }
 0x1ec   : > { %1243 = vmatmul.mubr.bf16.gmra.mxu0 %v914_v21  ;;  %1374 = vmatmul.mubr.bf16.gmra.mxu1 %v914_v21 }
 0x1ed   : > { %1252 = vmatprep.mubr.bf16.mxu0 %v3294_v1  ;;  %1383 = vmatprep.mubr.bf16.mxu1 %v3294_v1  ;;  %v3658_v1 = vrot.slane %v948_v29, %v952_v27 }
 0x1f4   : > { %1253 = vmatmul.mubr.bf16.gmra.mxu0 %v915_v23  ;;  %1384 = vmatmul.mubr.bf16.gmra.mxu1 %v915_v23 }
 0x253   : > { %v1164_v30 = vpop.f32.mrf.mxu0  ;;  %v1295_v31 = vpop.f32.mrf.mxu1 }
 0x254   : > { %v1165_v44 = vadd.f32 %v1164_v30, %v3658_v1  ;;  %v1296_v46 = vadd.f32 %v1295_v31, %v3660_v34 }
 0x255   : > { %v1166_v35 = vpop.f32.mrf.mxu0  ;;  %v1297_v39 = vpop.f32.mrf.mxu1 }
 0x256   : > { %v1167_v38 = vadd.f32 %v1166_v35, %v3654_v32  ;;  %v1298_v40 = vadd.f32 %v1297_v39, %v3656_v33  ;;  %v1392_v59 = vmax.f32 %v1165_v44, 0.0  ;;  %v1394_v60 = vmax.f32 %v1296_v46, 0.0 }
 0x257   : > { %v1168_v36 = vpop.f32.mrf.mxu0  ;;  %v1299_v37 = vpop.f32.mrf.mxu1 }
 0x258   : > { %v1169_v41 = vadd.f32 %v1168_v36, %v3658_v1  ;;  %v1300_v43 = vadd.f32 %v1299_v37, %v3660_v34  ;;  %v1393_v55 = vmax.f32 %v1167_v38, 0.0  ;;  %v1395_v56 = vmax.f32 %v1298_v40, 0.0 }
 0x259   : > { %v1170_v47 = vpop.f32.mrf.mxu0  ;;  %v1301_v48 = vpop.f32.mrf.mxu1 }
 0x25a   : > { %v1171_v49 = vadd.f32 %v1170_v47, %v3654_v32  ;;  %v1302_v50 = vadd.f32 %v1301_v48, %v3656_v33  ;;  %v1396_v51 = vmax.f32 %v1169_v41, 0.0  ;;  %v1398_v52 = vmax.f32 %v1300_v43, 0.0 }
 0x25b   : > { %v1174_v53 = vpop.f32.mrf.mxu0  ;;  %v1305_v54 = vpop.f32.mrf.mxu1 }
 0x25c   : > { %v1397_v57 = vmax.f32 %v1171_v49, 0.0  ;;  %v1399_v58 = vmax.f32 %v1302_v50, 0.0  ;;  %v1468_v45 = vpack.c.bf16 %v1396_v51, %v1392_v59  ;;  %v1470_v0 = vpack.c.bf16 %v1398_v52, %v1394_v60 }
 0x25d   : > { %v1176_v61 = vpop.f32.mrf.mxu0  ;;  %v1307_v42 = vpop.f32.mrf.mxu1  ;;  %v1175_v8 = vadd.f32 %v1174_v53, %v3658_v1  ;;  %v1306_v9 = vadd.f32 %v1305_v54, %v3660_v34 }
 0x25e   : > { %v1469_v62 = vpack.c.bf16 %v1397_v57, %v1393_v55  ;;  %v1471_v63 = vpack.c.bf16 %v1399_v58, %v1395_v56  ;;  %v1177_v2 = vadd.f32 %v1176_v61, %v3654_v32  ;;  %v1308_v5 = vadd.f32 %v1307_v42, %v3656_v33 }
 0x25f   : > { %v1178_v3 = vpop.f32.mrf.mxu0  ;;  %v1309_v4 = vpop.f32.mrf.mxu1  ;;  %v1400_v20 = vmax.f32 %v1175_v8, 0.0  ;;  %v1402_v21 = vmax.f32 %v1306_v9, 0.0 }
 0x260   : > { %v1179_v6 = vadd.f32 %v1178_v3, %v3658_v1  ;;  %v1310_v7 = vadd.f32 %v1309_v4, %v3660_v34  ;;  %1803 = vmatprep.mubr.bf16.mxu0 %v1469_v62  ;;  %1915 = vmatprep.mubr.bf16.mxu1 %v1471_v63  ;;  %v1401_v16 = vmax.f32 %v1177_v2, 0.0  ;;  %v1403_v17 = vmax.f32 %v1308_v5, 0.0 }
 0x261   : > { %v1180_v10 = vpop.f32.mrf.mxu0  ;;  %v1311_v11 = vpop.f32.mrf.mxu1  ;;  %1804 = vmatmul.mubr.bf16.vlgmr.msra.gmra.mxu0 %v1468_v45  ;;  %1916 = vmatmul.mubr.bf16.vlgmr.msra.gmra.mxu1 %v1470_v0 }
 0x262   : > { %v1181_v12 = vadd.f32 %v1180_v10, %v3654_v32  ;;  %v1312_v13 = vadd.f32 %v1311_v11, %v3656_v33  ;;  %v1404_v14 = vmax.f32 %v1179_v6, 0.0  ;;  %v1406_v15 = vmax.f32 %v1310_v7, 0.0 }
 0x264   : > { %v1405_v18 = vmax.f32 %v1181_v12, 0.0  ;;  %v1407_v19 = vmax.f32 %v1312_v13, 0.0  ;;  %v1472_v24 = vpack.c.bf16 %v1404_v14, %v1400_v20  ;;  %v1474_v25 = vpack.c.bf16 %v1406_v15, %v1402_v21 }
 0x266   : > { %v1473_v22 = vpack.c.bf16 %v1405_v18, %v1401_v16  ;;  %v1475_v23 = vpack.c.bf16 %v1407_v19, %v1403_v17 }
 0x268   : > { %1811 = vmatprep.mubr.bf16.mxu0 %v1473_v22  ;;  %1923 = vmatprep.mubr.bf16.mxu1 %v1475_v23 }
 0x269   : > { %1812 = vmatmul.mubr.bf16.gmra.mxu0 %v1472_v24  ;;  %1924 = vmatmul.mubr.bf16.gmra.mxu1 %v1474_v25 }
 0x26a   : > { %v1184_v26 = vpop.f32.mrf.mxu0  ;;  %v1315_v27 = vpop.f32.mrf.mxu1 }
 0x26b   : > { %v1185_v38 = vadd.f32 %v1184_v26, %v3658_v1  ;;  %v1316_v40 = vadd.f32 %v1315_v27, %v3660_v34 }
 0x26c   : > { %v1186_v28 = vpop.f32.mrf.mxu0  ;;  %v1317_v29 = vpop.f32.mrf.mxu1 }
 0x26d   : > { %v1187_v35 = vadd.f32 %v1186_v28, %v3654_v32  ;;  %v1318_v39 = vadd.f32 %v1317_v29, %v3656_v33  ;;  %v1408_v55 = vmax.f32 %v1185_v38, 0.0  ;;  %v1410_v56 = vmax.f32 %v1316_v40, 0.0 }
 0x26e   : > { %v1188_v30 = vpop.f32.mrf.mxu0  ;;  %v1319_v31 = vpop.f32.mrf.mxu1 }
 0x26f   : > { %v1189_v36 = vadd.f32 %v1188_v30, %v3658_v1  ;;  %v1320_v37 = vadd.f32 %v1319_v31, %v3660_v34  ;;  %v1409_v51 = vmax.f32 %v1187_v35, 0.0  ;;  %v1411_v52 = vmax.f32 %v1318_v39, 0.0 }
 0x270   : > { %v1190_v41 = vpop.f32.mrf.mxu0  ;;  %v1321_v43 = vpop.f32.mrf.mxu1 }
 0x271   : > { %v1191_v44 = vadd.f32 %v1190_v41, %v3654_v32  ;;  %v1322_v46 = vadd.f32 %v1321_v43, %v3656_v33  ;;  %v1412_v47 = vmax.f32 %v1189_v36, 0.0  ;;  %v1414_v48 = vmax.f32 %v1320_v37, 0.0 }
 0x272   : > { %v1194_v49 = vpop.f32.mrf.mxu0  ;;  %v1325_v50 = vpop.f32.mrf.mxu1 }
 0x273   : > { %v1413_v53 = vmax.f32 %v1191_v44, 0.0  ;;  %v1415_v54 = vmax.f32 %v1322_v46, 0.0  ;;  %v1476_v61 = vpack.c.bf16 %v1412_v47, %v1408_v55  ;;  %v1478_v42 = vpack.c.bf16 %v1414_v48, %v1410_v56 }
 0x274   : > { %v1196_v57 = vpop.f32.mrf.mxu0  ;;  %v1327_v58 = vpop.f32.mrf.mxu1  ;;  %v1195_v4 = vadd.f32 %v1194_v49, %v3658_v1  ;;  %v1326_v5 = vadd.f32 %v1325_v50, %v3660_v34 }
 0x275   : > { %v1477_v59 = vpack.c.bf16 %v1413_v53, %v1409_v51  ;;  %v1479_v60 = vpack.c.bf16 %v1415_v54, %v1411_v52  ;;  %v1197_v62 = vadd.f32 %v1196_v57, %v3654_v32  ;;  %v1328_v0 = vadd.f32 %v1327_v58, %v3656_v33 }
 0x276   : > { %v1198_v63 = vpop.f32.mrf.mxu0  ;;  %v1329_v45 = vpop.f32.mrf.mxu1  ;;  %v1416_v16 = vmax.f32 %v1195_v4, 0.0  ;;  %v1418_v17 = vmax.f32 %v1326_v5, 0.0 }
 0x277   : > { %v1199_v2 = vadd.f32 %v1198_v63, %v3658_v1  ;;  %v1330_v3 = vadd.f32 %v1329_v45, %v3660_v34  ;;  %1819 = vmatprep.mubr.bf16.mxu0 %v1477_v59  ;;  %1931 = vmatprep.mubr.bf16.mxu1 %v1479_v60  ;;  %v1417_v12 = vmax.f32 %v1197_v62, 0.0  ;;  %v1419_v13 = vmax.f32 %v1328_v0, 0.0 }
 0x278   : > { %v1200_v6 = vpop.f32.mrf.mxu0  ;;  %v1331_v7 = vpop.f32.mrf.mxu1  ;;  %1820 = vmatmul.mubr.bf16.gmra.mxu0 %v1476_v61  ;;  %1932 = vmatmul.mubr.bf16.gmra.mxu1 %v1478_v42 }
 0x279   : > { %v1201_v8 = vadd.f32 %v1200_v6, %v3654_v32  ;;  %v1332_v9 = vadd.f32 %v1331_v7, %v3656_v33  ;;  %v1420_v10 = vmax.f32 %v1199_v2, 0.0  ;;  %v1422_v11 = vmax.f32 %v1330_v3, 0.0 }
 0x27b   : > { %v1421_v14 = vmax.f32 %v1201_v8, 0.0  ;;  %v1423_v15 = vmax.f32 %v1332_v9, 0.0  ;;  %v1480_v20 = vpack.c.bf16 %v1420_v10, %v1416_v16  ;;  %v1482_v21 = vpack.c.bf16 %v1422_v11, %v1418_v17 }
 0x27d   : > { %v1481_v18 = vpack.c.bf16 %v1421_v14, %v1417_v12  ;;  %v1483_v19 = vpack.c.bf16 %v1423_v15, %v1419_v13 }
 0x27f   : > { %1827 = vmatprep.mubr.bf16.mxu0 %v1481_v18  ;;  %1939 = vmatprep.mubr.bf16.mxu1 %v1483_v19 }
 0x280   : > { %1828 = vmatmul.mubr.bf16.gmra.mxu0 %v1480_v20  ;;  %1940 = vmatmul.mubr.bf16.gmra.mxu1 %v1482_v21 }
 0x282   : > { %v1204_v22 = vpop.f32.mrf.mxu0  ;;  %v1335_v23 = vpop.f32.mrf.mxu1 }
 0x283   : > { %v1205_v35 = vadd.f32 %v1204_v22, %v3658_v1  ;;  %v1336_v39 = vadd.f32 %v1335_v23, %v3660_v34 }
 0x284   : > { %v1206_v24 = vpop.f32.mrf.mxu0  ;;  %v1337_v25 = vpop.f32.mrf.mxu1 }
 0x285   : > { %v1207_v28 = vadd.f32 %v1206_v24, %v3654_v32  ;;  %v1338_v29 = vadd.f32 %v1337_v25, %v3656_v33  ;;  %v1424_v51 = vmax.f32 %v1205_v35, 0.0  ;;  %v1426_v52 = vmax.f32 %v1336_v39, 0.0 }
 0x286   : > { %v1208_v26 = vpop.f32.mrf.mxu0  ;;  %v1339_v27 = vpop.f32.mrf.mxu1 }
 0x287   : > { %v1209_v30 = vadd.f32 %v1208_v26, %v3658_v1  ;;  %v1340_v31 = vadd.f32 %v1339_v27, %v3660_v34  ;;  %v1425_v47 = vmax.f32 %v1207_v28, 0.0  ;;  %v1427_v48 = vmax.f32 %v1338_v29, 0.0 }
 0x288   : > { %v1210_v36 = vpop.f32.mrf.mxu0  ;;  %v1341_v37 = vpop.f32.mrf.mxu1 }
 0x289   : > { %v1211_v38 = vadd.f32 %v1210_v36, %v3654_v32  ;;  %v1342_v40 = vadd.f32 %v1341_v37, %v3656_v33  ;;  %v1428_v41 = vmax.f32 %v1209_v30, 0.0  ;;  %v1430_v43 = vmax.f32 %v1340_v31, 0.0 }
 0x28a   : > { %v1214_v44 = vpop.f32.mrf.mxu0  ;;  %v1345_v46 = vpop.f32.mrf.mxu1 }
 0x28b   : > { %v1429_v49 = vmax.f32 %v1211_v38, 0.0  ;;  %v1431_v50 = vmax.f32 %v1342_v40, 0.0  ;;  %v1484_v57 = vpack.c.bf16 %v1428_v41, %v1424_v51  ;;  %v1486_v58 = vpack.c.bf16 %v1430_v43, %v1426_v52 }
 0x28c   : > { %v1216_v53 = vpop.f32.mrf.mxu0  ;;  %v1347_v54 = vpop.f32.mrf.mxu1  ;;  %v1215_v45 = vadd.f32 %v1214_v44, %v3658_v1  ;;  %v1346_v0 = vadd.f32 %v1345_v46, %v3660_v34 }
 0x28d   : > { %v1485_v55 = vpack.c.bf16 %v1429_v49, %v1425_v47  ;;  %v1487_v56 = vpack.c.bf16 %v1431_v50, %v1427_v48  ;;  %v1217_v59 = vadd.f32 %v1216_v53, %v3654_v32  ;;  %v1348_v42 = vadd.f32 %v1347_v54, %v3656_v33 }
 0x28e   : > { %v1218_v60 = vpop.f32.mrf.mxu0  ;;  %v1349_v61 = vpop.f32.mrf.mxu1  ;;  %v1432_v12 = vmax.f32 %v1215_v45, 0.0  ;;  %v1434_v13 = vmax.f32 %v1346_v0, 0.0 }
 0x28f   : > { %v1219_v62 = vadd.f32 %v1218_v60, %v3658_v1  ;;  %v1350_v63 = vadd.f32 %v1349_v61, %v3660_v34  ;;  %1835 = vmatprep.mubr.bf16.mxu0 %v1485_v55  ;;  %1947 = vmatprep.mubr.bf16.mxu1 %v1487_v56  ;;  %v1433_v8 = vmax.f32 %v1217_v59, 0.0  ;;  %v1435_v9 = vmax.f32 %v1348_v42, 0.0 }
 0x290   : > { %v1220_v2 = vpop.f32.mrf.mxu0  ;;  %v1351_v3 = vpop.f32.mrf.mxu1  ;;  %1836 = vmatmul.mubr.bf16.gmra.mxu0 %v1484_v57  ;;  %1948 = vmatmul.mubr.bf16.gmra.mxu1 %v1486_v58 }
 0x291   : > { %v1221_v4 = vadd.f32 %v1220_v2, %v3654_v32  ;;  %v1352_v5 = vadd.f32 %v1351_v3, %v3656_v33  ;;  %v1436_v6 = vmax.f32 %v1219_v62, 0.0  ;;  %v1438_v7 = vmax.f32 %v1350_v63, 0.0 }
 0x293   : > { %v1437_v10 = vmax.f32 %v1221_v4, 0.0  ;;  %v1439_v11 = vmax.f32 %v1352_v5, 0.0  ;;  %v1488_v16 = vpack.c.bf16 %v1436_v6, %v1432_v12  ;;  %v1490_v17 = vpack.c.bf16 %v1438_v7, %v1434_v13 }
 0x295   : > { %v1489_v14 = vpack.c.bf16 %v1437_v10, %v1433_v8  ;;  %v1491_v15 = vpack.c.bf16 %v1439_v11, %v1435_v9 }
 0x297   : > { %1843 = vmatprep.mubr.bf16.mxu0 %v1489_v14  ;;  %1955 = vmatprep.mubr.bf16.mxu1 %v1491_v15 }
 0x298   : > { %1844 = vmatmul.mubr.bf16.gmra.mxu0 %v1488_v16  ;;  %1956 = vmatmul.mubr.bf16.gmra.mxu1 %v1490_v17 }
 0x29a   : > { %v1224_v18 = vpop.f32.mrf.mxu0  ;;  %v1355_v19 = vpop.f32.mrf.mxu1 }
 0x29b   : > { %v1225_v28 = vadd.f32 %v1224_v18, %v3658_v1  ;;  %v1356_v29 = vadd.f32 %v1355_v19, %v3660_v34 }
 0x29c   : > { %v1226_v20 = vpop.f32.mrf.mxu0  ;;  %v1357_v21 = vpop.f32.mrf.mxu1 }
 0x29d   : > { %v1227_v24 = vadd.f32 %v1226_v20, %v3654_v32  ;;  %v1358_v25 = vadd.f32 %v1357_v21, %v3656_v33  ;;  %v1440_v47 = vmax.f32 %v1225_v28, 0.0  ;;  %v1442_v48 = vmax.f32 %v1356_v29, 0.0 }
 0x29e   : > { %v1228_v22 = vpop.f32.mrf.mxu0  ;;  %v1359_v23 = vpop.f32.mrf.mxu1 }
 0x29f   : > { %v1229_v26 = vadd.f32 %v1228_v22, %v3658_v1  ;;  %v1360_v27 = vadd.f32 %v1359_v23, %v3660_v34  ;;  %v1441_v41 = vmax.f32 %v1227_v24, 0.0  ;;  %v1443_v43 = vmax.f32 %v1358_v25, 0.0 }
 0x2a0   : > { %v1230_v30 = vpop.f32.mrf.mxu0  ;;  %v1361_v31 = vpop.f32.mrf.mxu1 }
 0x2a1   : > { %v1231_v35 = vadd.f32 %v1230_v30, %v3654_v32  ;;  %v1362_v39 = vadd.f32 %v1361_v31, %v3656_v33  ;;  %v1444_v36 = vmax.f32 %v1229_v26, 0.0  ;;  %v1446_v37 = vmax.f32 %v1360_v27, 0.0 }
 0x2a2   : > { %v1234_v38 = vpop.f32.mrf.mxu0  ;;  %v1365_v40 = vpop.f32.mrf.mxu1 }
 0x2a3   : > { %v1445_v44 = vmax.f32 %v1231_v35, 0.0  ;;  %v1447_v46 = vmax.f32 %v1362_v39, 0.0  ;;  %v1492_v53 = vpack.c.bf16 %v1444_v36, %v1440_v47  ;;  %v1494_v54 = vpack.c.bf16 %v1446_v37, %v1442_v48 }
 0x2a4   : > { %v1236_v49 = vpop.f32.mrf.mxu0  ;;  %v1367_v50 = vpop.f32.mrf.mxu1  ;;  %v1235_v61 = vadd.f32 %v1234_v38, %v3658_v1  ;;  %v1366_v42 = vadd.f32 %v1365_v40, %v3660_v34 }
 0x2a5   : > { %v1493_v51 = vpack.c.bf16 %v1445_v44, %v1441_v41  ;;  %v1495_v52 = vpack.c.bf16 %v1447_v46, %v1443_v43  ;;  %v1237_v55 = vadd.f32 %v1236_v49, %v3654_v32  ;;  %v1368_v58 = vadd.f32 %v1367_v50, %v3656_v33 }
 0x2a6   : > { %v1238_v56 = vpop.f32.mrf.mxu0  ;;  %v1369_v57 = vpop.f32.mrf.mxu1  ;;  %v1448_v8 = vmax.f32 %v1235_v61, 0.0  ;;  %v1450_v9 = vmax.f32 %v1366_v42, 0.0 }
 0x2a7   : > { %v1239_v59 = vadd.f32 %v1238_v56, %v3658_v1  ;;  %v1370_v60 = vadd.f32 %v1369_v57, %v3660_v34  ;;  %1851 = vmatprep.mubr.bf16.mxu0 %v1493_v51  ;;  %1963 = vmatprep.mubr.bf16.mxu1 %v1495_v52  ;;  %v1449_v4 = vmax.f32 %v1237_v55, 0.0  ;;  %v1451_v5 = vmax.f32 %v1368_v58, 0.0 }
 0x2a8   : > { %v1240_v62 = vpop.f32.mrf.mxu0  ;;  %v1371_v63 = vpop.f32.mrf.mxu1  ;;  %1852 = vmatmul.mubr.bf16.gmra.mxu0 %v1492_v53  ;;  %1964 = vmatmul.mubr.bf16.gmra.mxu1 %v1494_v54 }
 0x2a9   : > { %v1241_v45 = vadd.f32 %v1240_v62, %v3654_v32  ;;  %v1372_v0 = vadd.f32 %v1371_v63, %v3656_v33  ;;  %v1452_v2 = vmax.f32 %v1239_v59, 0.0  ;;  %v1454_v3 = vmax.f32 %v1370_v60, 0.0 }
 0x2ab   : > { %v1453_v6 = vmax.f32 %v1241_v45, 0.0  ;;  %v1455_v7 = vmax.f32 %v1372_v0, 0.0  ;;  %v1496_v14 = vpack.c.bf16 %v1452_v2, %v1448_v8  ;;  %v1498_v15 = vpack.c.bf16 %v1454_v3, %v1450_v9  ;;  %v3741_v45 = vld [vmem:[%s3985_s5] ss:$0 sm:$0xff] }
 0x2ac   : > { %v1244_v10 = vpop.f32.mrf.mxu0  ;;  %v1375_v11 = vpop.f32.mrf.mxu1 }
 0x2ad   : > { %v1497_v12 = vpack.c.bf16 %v1453_v6, %v1449_v4  ;;  %v1499_v13 = vpack.c.bf16 %v1455_v7, %v1451_v5  ;;  %v1245_v24 = vadd.f32 %v1244_v10, %v3658_v1  ;;  %v1376_v25 = vadd.f32 %v1375_v11, %v3660_v34 }
 0x2ae   : > { %v1246_v16 = vpop.f32.mrf.mxu0  ;;  %v1377_v17 = vpop.f32.mrf.mxu1 }
 0x2af   : > { %1859 = vmatprep.mubr.bf16.mxu0 %v1497_v12  ;;  %1971 = vmatprep.mubr.bf16.mxu1 %v1499_v13  ;;  %v1247_v20 = vadd.f32 %v1246_v16, %v3654_v32  ;;  %v1378_v21 = vadd.f32 %v1377_v17, %v3656_v33  ;;  %v1456_v41 = vmax.f32 %v1245_v24, 0.0  ;;  %v1458_v43 = vmax.f32 %v1376_v25, 0.0 }
 0x2b0   : > { %v1248_v18 = vpop.f32.mrf.mxu0  ;;  %v1379_v19 = vpop.f32.mrf.mxu1  ;;  %1860 = vmatmul.mubr.bf16.gmra.mxu0 %v1496_v14  ;;  %1972 = vmatmul.mubr.bf16.gmra.mxu1 %v1498_v15 }
 0x2b1   : > { %v1249_v22 = vadd.f32 %v1248_v18, %v3658_v1  ;;  %v1380_v23 = vadd.f32 %v1379_v19, %v3660_v34  ;;  %v1457_v36 = vmax.f32 %v1247_v20, 0.0  ;;  %v1459_v37 = vmax.f32 %v1378_v21, 0.0 }
 0x2b2   : > { %v1250_v26 = vpop.f32.mrf.mxu0  ;;  %v1381_v27 = vpop.f32.mrf.mxu1 }
 0x2b3   : > { %v1251_v28 = vadd.f32 %v1250_v26, %v3654_v32  ;;  %v1382_v29 = vadd.f32 %v1381_v27, %v3656_v33  ;;  %v1460_v30 = vmax.f32 %v1249_v22, 0.0  ;;  %v1462_v31 = vmax.f32 %v1380_v23, 0.0 }
 0x2b4   : > { %v1254_v35 = vpop.f32.mrf.mxu0  ;;  %v1385_v39 = vpop.f32.mrf.mxu1 }
 0x2b5   : > { %v1461_v38 = vmax.f32 %v1251_v28, 0.0  ;;  %v1463_v40 = vmax.f32 %v1382_v29, 0.0  ;;  %v1500_v51 = vpack.c.bf16 %v1460_v30, %v1456_v41  ;;  %v1502_v52 = vpack.c.bf16 %v1462_v31, %v1458_v43 }
 0x2b6   : > { %v1256_v44 = vpop.f32.mrf.mxu0  ;;  %v1387_v46 = vpop.f32.mrf.mxu1  ;;  %v1255_v53 = vadd.f32 %v1254_v35, %v3658_v1  ;;  %v1386_v54 = vadd.f32 %v1385_v39, %v3660_v34 }
 0x2b7   : > { %v1501_v47 = vpack.c.bf16 %v1461_v38, %v1457_v36  ;;  %v1503_v48 = vpack.c.bf16 %v1463_v40, %v1459_v37  ;;  %v1257_v49 = vadd.f32 %v1256_v44, %v3654_v32  ;;  %v1388_v50 = vadd.f32 %v1387_v46, %v3656_v33 }
 0x2b8   : > { %v1258_v55 = vpop.f32.mrf.mxu0  ;;  %v1389_v56 = vpop.f32.mrf.mxu1  ;;  %v1464_v42 = vmax.f32 %v1255_v53, 0.0  ;;  %v1466_v33 = vmax.f32 %v1386_v54, 0.0 }
 0x2b9   : > { %v1465_v57 = vmax.f32 %v1257_v49, 0.0  ;;  %v1467_v58 = vmax.f32 %v1388_v50, 0.0  ;;  %1867 = vmatprep.mubr.bf16.mxu0 %v1501_v47  ;;  %1979 = vmatprep.mubr.bf16.mxu1 %v1503_v48 }
 0x2ba   : > { %v1259_v59 = vpop.f32.mrf.mxu0  ;;  %v1390_v60 = vpop.f32.mrf.mxu1  ;;  %1868 = vmatmul.mubr.bf16.gmra.mxu0 %v1500_v51  ;;  %1980 = vmatmul.mubr.bf16.gmra.mxu1 %v1502_v52  ;;  %v1504_v62 = vpack.c.bf16 %v1464_v42, %v1464_v42  ;;  %v1506_v1 = vpack.c.bf16 %v1466_v33, %v1466_v33 }
 0x2bb   : > { %v1505_v61 = vpack.c.bf16 %v1465_v57, %v1465_v57  ;;  %v1507_v32 = vpack.c.bf16 %v1467_v58, %v1467_v58 }
 0x2bd   : > { %1875 = vmatprep.mubr.bf16.mxu0 %v1505_v61  ;;  %1987 = vmatprep.mubr.bf16.mxu1 %v1507_v32 }
 0x2c2   : > { %1876 = vmatmul.mubr.bf16.gmra.mxu0 %v1504_v62  ;;  %1988 = vmatmul.mubr.bf16.gmra.mxu1 %v1506_v1 }
 0x321   : > { %v2694_v34 = vpop.f32.mrf.mxu0  ;;  %v2770_v63 = vpop.f32.mrf.mxu1 }
 0x323   : > { %v2695_v0 = vpop.f32.mrf.mxu0  ;;  %v2771_v2 = vpop.f32.mrf.mxu1 }
 0x324   : > { %v2696_v3 = vadd.f32 %v2695_v0, %v2694_v34  ;;  %v2772_v7 = vadd.f32 %v2771_v2, %v2770_v63 }
 0x325   : > { %v2697_v4 = vpop.f32.mrf.mxu0  ;;  %v2773_v5 = vpop.f32.mrf.mxu1 }
 0x326   : > { %v1806_v6 = vadd.f32 %v2696_v3, %v3741_v45 }
 0x327   : > { %v2698_v8 = vpop.f32.mrf.mxu0  ;;  %v2774_v9 = vpop.f32.mrf.mxu1 }
 0x328   : > { %v2699_v10 = vadd.f32 %v2698_v8, %v2697_v4  ;;  %v3744_v11 = vadd.f32 %v2772_v7, %v1806_v6  ;;  %v2775_v15 = vadd.f32 %v2774_v9, %v2773_v5 }
 0x329   : > { %v2700_v12 = vpop.f32.mrf.mxu0  ;;  %v2776_v13 = vpop.f32.mrf.mxu1 }
 0x32a   : > { %v1809_v14 = vadd.f32 %v2699_v10, %v3741_v45  ;;  %1995 = vmax.xlane.f32.xlu0 %v3744_v11 }
 0x32b   : > { %v2701_v16 = vpop.f32.mrf.mxu0  ;;  %v2777_v17 = vpop.f32.mrf.mxu1 }
 0x32c   : > { %v2702_v18 = vadd.f32 %v2701_v16, %v2700_v12  ;;  %v3748_v19 = vadd.f32 %v2775_v15, %v1809_v14  ;;  %v2778_v23 = vadd.f32 %v2777_v17, %v2776_v13 }
 0x32d   : > { %v2703_v20 = vpop.f32.mrf.mxu0  ;;  %v2779_v21 = vpop.f32.mrf.mxu1 }
 0x32e   : > { %v1814_v22 = vadd.f32 %v2702_v18, %v3741_v45  ;;  %1997 = vmax.xlane.f32.xlu1 %v3748_v19 }
 0x32f   : > { %v2704_v24 = vpop.f32.mrf.mxu0  ;;  %v2780_v25 = vpop.f32.mrf.mxu1 }
 0x330   : > { %v2705_v26 = vadd.f32 %v2704_v24, %v2703_v20  ;;  %v3752_v27 = vadd.f32 %v2778_v23, %v1814_v22  ;;  %v2781_v29 = vadd.f32 %v2780_v25, %v2779_v21 }
 0x332   : > { %v1817_v28 = vadd.f32 %v2705_v26, %v3741_v45  ;;  %1999 = vmax.xlane.f32.xlu0 %v3752_v27 }
 0x334   : > { %v3756_v30 = vadd.f32 %v2781_v29, %v1817_v28 }
 0x336   : > { %2001 = vmax.xlane.f32.xlu0 %v3756_v30 }
 0x338   : > { %v2706_v31 = vpop.f32.mrf.mxu0  ;;  %v2782_v35 = vpop.f32.mrf.mxu1 }
 0x33a   : > { %v2707_v39 = vpop.f32.mrf.mxu0  ;;  %v2783_v36 = vpop.f32.mrf.mxu1 }
 0x33b   : > { %v2708_v37 = vadd.f32 %v2707_v39, %v2706_v31  ;;  %v2784_v43 = vadd.f32 %v2783_v36, %v2782_v35 }
 0x33c   : > { %v2709_v38 = vpop.f32.mrf.mxu0  ;;  %v2785_v40 = vpop.f32.mrf.mxu1 }
 0x33d   : > { %v1822_v41 = vadd.f32 %v2708_v37, %v3741_v45 }
 0x33e   : > { %v2710_v44 = vpop.f32.mrf.mxu0  ;;  %v2786_v46 = vpop.f32.mrf.mxu1 }
 0x33f   : > { %v2711_v47 = vadd.f32 %v2710_v44, %v2709_v38  ;;  %v3760_v48 = vadd.f32 %v2784_v43, %v1822_v41  ;;  %v2787_v52 = vadd.f32 %v2786_v46, %v2785_v40 }
 0x340   : > { %v2712_v49 = vpop.f32.mrf.mxu0  ;;  %v2788_v50 = vpop.f32.mrf.mxu1 }
 0x341   : > { %v1825_v51 = vadd.f32 %v2711_v47, %v3741_v45  ;;  %2003 = vmax.xlane.f32.xlu1 %v3760_v48 }
 0x342   : > { %v2713_v53 = vpop.f32.mrf.mxu0  ;;  %v2789_v54 = vpop.f32.mrf.mxu1 }
 0x343   : > { %v2714_v55 = vadd.f32 %v2713_v53, %v2712_v49  ;;  %v3764_v56 = vadd.f32 %v2787_v52, %v1825_v51  ;;  %v2790_v60 = vadd.f32 %v2789_v54, %v2788_v50 }
 0x344   : > { %v2715_v57 = vpop.f32.mrf.mxu0  ;;  %v2791_v58 = vpop.f32.mrf.mxu1 }
 0x345   : > { %v1830_v59 = vadd.f32 %v2714_v55, %v3741_v45  ;;  %2005 = vmax.xlane.f32.xlu0 %v3764_v56 }
 0x346   : > { %v2716_v61 = vpop.f32.mrf.mxu0  ;;  %v2792_v32 = vpop.f32.mrf.mxu1 }
 0x347   : > { %v2717_v42 = vadd.f32 %v2716_v61, %v2715_v57  ;;  %v3768_v33 = vadd.f32 %v2790_v60, %v1830_v59  ;;  %v2793_v1 = vadd.f32 %v2792_v32, %v2791_v58 }
 0x349   : > { %v1833_v62 = vadd.f32 %v2717_v42, %v3741_v45  ;;  %2007 = vmax.xlane.f32.xlu1 %v3768_v33 }
 0x34b   : > { %v3772_v34 = vadd.f32 %v2793_v1, %v1833_v62 }
 0x34d   : > { %2009 = vmax.xlane.f32.xlu0 %v3772_v34 }
 0x350   : > { %v2718_v63 = vpop.f32.mrf.mxu0  ;;  %v2794_v0 = vpop.f32.mrf.mxu1 }
 0x352   : > { %v2719_v2 = vpop.f32.mrf.mxu0  ;;  %v2795_v3 = vpop.f32.mrf.mxu1 }
 0x353   : > { %v2720_v4 = vadd.f32 %v2719_v2, %v2718_v63  ;;  %v2796_v8 = vadd.f32 %v2795_v3, %v2794_v0 }
 0x354   : > { %v2721_v5 = vpop.f32.mrf.mxu0  ;;  %v2797_v6 = vpop.f32.mrf.mxu1 }
 0x355   : > { %v1838_v7 = vadd.f32 %v2720_v4, %v3741_v45 }
 0x356   : > { %v2722_v9 = vpop.f32.mrf.mxu0  ;;  %v2798_v10 = vpop.f32.mrf.mxu1 }
 0x357   : > { %v2723_v12 = vadd.f32 %v2722_v9, %v2721_v5  ;;  %v3776_v13 = vadd.f32 %v2796_v8, %v1838_v7  ;;  %v2799_v17 = vadd.f32 %v2798_v10, %v2797_v6 }
 0x358   : > { %v2724_v14 = vpop.f32.mrf.mxu0  ;;  %v2800_v15 = vpop.f32.mrf.mxu1 }
 0x359   : > { %v1841_v16 = vadd.f32 %v2723_v12, %v3741_v45  ;;  %2011 = vmax.xlane.f32.xlu1 %v3776_v13 }
 0x35a   : > { %v2725_v18 = vpop.f32.mrf.mxu0  ;;  %v2801_v20 = vpop.f32.mrf.mxu1 }
 0x35b   : > { %v2726_v21 = vadd.f32 %v2725_v18, %v2724_v14  ;;  %v3780_v22 = vadd.f32 %v2799_v17, %v1841_v16  ;;  %v2802_v26 = vadd.f32 %v2801_v20, %v2800_v15 }
 0x35c   : > { %v2727_v23 = vpop.f32.mrf.mxu0  ;;  %v2803_v24 = vpop.f32.mrf.mxu1 }
 0x35d   : > { %v1846_v25 = vadd.f32 %v2726_v21, %v3741_v45  ;;  %2013 = vmax.xlane.f32.xlu0 %v3780_v22 }
 0x35e   : > { %v2728_v28 = vpop.f32.mrf.mxu0  ;;  %v2804_v29 = vpop.f32.mrf.mxu1 }
 0x35f   : > { %v2729_v31 = vadd.f32 %v2728_v28, %v2727_v23  ;;  %v3784_v35 = vadd.f32 %v2802_v26, %v1846_v25  ;;  %v2805_v36 = vadd.f32 %v2804_v29, %v2803_v24 }
 0x361   : > { %v1849_v39 = vadd.f32 %v2729_v31, %v3741_v45  ;;  %2015 = vmax.xlane.f32.xlu1 %v3784_v35 }
 0x363   : > { %v3788_v37 = vadd.f32 %v2805_v36, %v1849_v39 }
 0x365   : > { %2017 = vmax.xlane.f32.xlu0 %v3788_v37 }
 0x368   : > { %v2730_v38 = vpop.f32.mrf.mxu0  ;;  %v2806_v40 = vpop.f32.mrf.mxu1 }
 0x36a   : > { %v2731_v41 = vpop.f32.mrf.mxu0  ;;  %v2807_v43 = vpop.f32.mrf.mxu1 }
 0x36b   : > { %v2732_v44 = vadd.f32 %v2731_v41, %v2730_v38  ;;  %v2808_v50 = vadd.f32 %v2807_v43, %v2806_v40 }
 0x36c   : > { %v2733_v46 = vpop.f32.mrf.mxu0  ;;  %v2809_v47 = vpop.f32.mrf.mxu1 }
 0x36d   : > { %v1854_v49 = vadd.f32 %v2732_v44, %v3741_v45 }
 0x36e   : > { %v2734_v51 = vpop.f32.mrf.mxu0  ;;  %v2810_v52 = vpop.f32.mrf.mxu1 }
 0x36f   : > { %v2735_v53 = vadd.f32 %v2734_v51, %v2733_v46  ;;  %v3792_v54 = vadd.f32 %v2808_v50, %v1854_v49  ;;  %v2811_v59 = vadd.f32 %v2810_v52, %v2809_v47 }
 0x370   : > { %v2736_v55 = vpop.f32.mrf.mxu0  ;;  %v2812_v57 = vpop.f32.mrf.mxu1 }
 0x371   : > { %v1857_v58 = vadd.f32 %v2735_v53, %v3741_v45  ;;  %2019 = vmax.xlane.f32.xlu1 %v3792_v54 }
 0x372   : > { %v2737_v60 = vpop.f32.mrf.mxu0  ;;  %v2813_v61 = vpop.f32.mrf.mxu1 }
 0x373   : > { %v2738_v32 = vadd.f32 %v2737_v60, %v2736_v55  ;;  %v3796_v42 = vadd.f32 %v2811_v59, %v1857_v58  ;;  %v2814_v0 = vadd.f32 %v2813_v61, %v2812_v57 }
 0x374   : > { %v2739_v62 = vpop.f32.mrf.mxu0  ;;  %v2815_v1 = vpop.f32.mrf.mxu1 }
 0x375   : > { %v1862_v63 = vadd.f32 %v2738_v32, %v3741_v45  ;;  %2021 = vmax.xlane.f32.xlu0 %v3796_v42 }
 0x376   : > { %v2740_v2 = vpop.f32.mrf.mxu0  ;;  %v2816_v3 = vpop.f32.mrf.mxu1 }
 0x377   : > { %v2741_v4 = vadd.f32 %v2740_v2, %v2739_v62  ;;  %v3800_v5 = vadd.f32 %v2814_v0, %v1862_v63  ;;  %v2817_v7 = vadd.f32 %v2816_v3, %v2815_v1 }
 0x379   : > { %v1865_v6 = vadd.f32 %v2741_v4, %v3741_v45  ;;  %2023 = vmax.xlane.f32.xlu1 %v3800_v5 }
 0x37a   : > { %v2742_v8 = vpop.f32.mrf.mxu0  ;;  %v2818_v9 = vpop.f32.mrf.mxu1 }
 0x37b   : > { %v3804_v10 = vadd.f32 %v2817_v7, %v1865_v6 }
 0x37c   : > { %v2743_v12 = vpop.f32.mrf.mxu0  ;;  %v2819_v14 = vpop.f32.mrf.mxu1 }
 0x37d   : > { %v2744_v15 = vadd.f32 %v2743_v12, %v2742_v8  ;;  %2025 = vmax.xlane.f32.xlu0 %v3804_v10  ;;  %v2820_v20 = vadd.f32 %v2819_v14, %v2818_v9 }
 0x37e   : > { %v2745_v16 = vpop.f32.mrf.mxu0  ;;  %v2821_v17 = vpop.f32.mrf.mxu1 }
 0x37f   : > { %v1870_v18 = vadd.f32 %v2744_v15, %v3741_v45 }
 0x380   : > { %v2746_v21 = vpop.f32.mrf.mxu0  ;;  %v2822_v23 = vpop.f32.mrf.mxu1 }
 0x381   : > { %v2747_v24 = vadd.f32 %v2746_v21, %v2745_v16  ;;  %v3808_v25 = vadd.f32 %v2820_v20, %v1870_v18  ;;  %v2823_v31 = vadd.f32 %v2822_v23, %v2821_v17 }
 0x382   : > { %v2748_v26 = vpop.f32.mrf.mxu0  ;;  %v2824_v28 = vpop.f32.mrf.mxu1 }
 0x383   : > { %v1873_v29 = vadd.f32 %v2747_v24, %v3741_v45  ;;  %2027 = vmax.xlane.f32.xlu1 %v3808_v25 }
 0x384   : > { %v2749_v39 = vpop.f32.mrf.mxu0  ;;  %v2825_v36 = vpop.f32.mrf.mxu1 }
 0x385   : > { %v2750_v38 = vadd.f32 %v2749_v39, %v2748_v26  ;;  %v3812_v40 = vadd.f32 %v2823_v31, %v1873_v29  ;;  %v2826_v46 = vadd.f32 %v2825_v36, %v2824_v28 }
 0x386   : > { %v2751_v41 = vpop.f32.mrf.mxu0  ;;  %v2827_v43 = vpop.f32.mrf.mxu1 }
 0x387   : > { %v1878_v44 = vadd.f32 %v2750_v38, %v3741_v45  ;;  %2029 = vmax.xlane.f32.xlu0 %v3812_v40 }
 0x388   : > { %v2752_v47 = vpop.f32.mrf.mxu0  ;;  %v2828_v49 = vpop.f32.mrf.mxu1 }
 0x389   : > { %v3816_v50 = vadd.f32 %v2826_v46, %v1878_v44 }
 0x38b   : > { %2031 = vmax.xlane.f32.xlu1 %v3816_v50 }
 0x3b3   : > { %v1996_v51 = vpop.xlane.xlu0 %1995 }
 0x3b4   : > { %v3820_v52 = vsub.f32 %v3744_v11, %v1996_v51 }
 0x3b6   : > { %v2052_v53 = vmul.f32 1.442695, %v3820_v52 }
 0x3b7   : > { %v1998_v55 = vpop.xlane.xlu1 %1997 }
 0x3b8   : > { %3091 = vpow2.f32 %v2052_v53  ;;  %v3824_v57 = vsub.f32 %v3748_v19, %v1998_v55 }
 0x3ba   : > { %v2054_v45 = vmul.f32 1.442695, %v3824_v57 }
 0x3bb   : > { %v2000_v58 = vpop.xlane.xlu0 %1999 }
 0x3bc   : > { %3093 = vpow2.f32 %v2054_v45  ;;  %v3828_v59 = vsub.f32 %v3752_v27, %v2000_v58 }
 0x3be   : > { %v2056_v60 = vmul.f32 1.442695, %v3828_v59 }
 0x3bf   : > { %v2002_v61 = vpop.xlane.xlu0 %2001 }
 0x3c0   : > { %3095 = vpow2.f32 %v2056_v60  ;;  %v3832_v11 = vsub.f32 %v3756_v30, %v2002_v61 }
 0x3c2   : > { %v2058_v32 = vmul.f32 1.442695, %v3832_v11 }
 0x3c4   : > { %3097 = vpow2.f32 %v2058_v32 }
 0x3c5   : > { %v3092_v62 = vpop.eup %3091 }
 0x3c6   : > { %2090 = vadd.xlane.f32.xlu0 %v3092_v62 }
 0x3c9   : > { %v3094_v19 = vpop.eup %3093 }
 0x3ca   : > { %2092 = vadd.xlane.f32.xlu1 %v3094_v19  ;;  %v2004_v1 = vpop.xlane.xlu1 %2003 }
 0x3cb   : > { %v3836_v63 = vsub.f32 %v3760_v48, %v2004_v1 }
 0x3cd   : > { %v3096_v27 = vpop.eup %3095  ;;  %v2060_v0 = vmul.f32 1.442695, %v3836_v63 }
 0x3ce   : > { %2094 = vadd.xlane.f32.xlu0 %v3096_v27  ;;  %v2006_v2 = vpop.xlane.xlu0 %2005 }
 0x3cf   : > { %3099 = vpow2.f32 %v2060_v0  ;;  %v3840_v30 = vsub.f32 %v3764_v56, %v2006_v2 }
 0x3d1   : > { %v3098_v3 = vpop.eup %3097  ;;  %v2062_v4 = vmul.f32 1.442695, %v3840_v30 }
 0x3d2   : > { %2096 = vadd.xlane.f32.xlu1 %v3098_v3  ;;  %v2008_v6 = vpop.xlane.xlu1 %2007 }
 0x3d3   : > { %3101 = vpow2.f32 %v2062_v4  ;;  %v3844_v7 = vsub.f32 %v3768_v33, %v2008_v6 }
 0x3d5   : > { %v2064_v48 = vmul.f32 1.442695, %v3844_v7 }
 0x3d6   : > { %v2010_v8 = vpop.xlane.xlu0 %2009 }
 0x3d7   : > { %3103 = vpow2.f32 %v2064_v48  ;;  %v3848_v9 = vsub.f32 %v3772_v34, %v2010_v8 }
 0x3d9   : > { %v2066_v12 = vmul.f32 1.442695, %v3848_v9 }
 0x3db   : > { %3105 = vpow2.f32 %v2066_v12 }
 0x3dc   : > { %v3100_v56 = vpop.eup %3099 }
 0x3dd   : > { %2098 = vadd.xlane.f32.xlu0 %v3100_v56 }
 0x3e0   : > { %v3102_v14 = vpop.eup %3101 }
 0x3e1   : > { %2100 = vadd.xlane.f32.xlu1 %v3102_v14 }
 0x3e2   : > { %v2012_v15 = vpop.xlane.xlu1 %2011 }
 0x3e3   : > { %v3852_v16 = vsub.f32 %v3776_v13, %v2012_v15 }
 0x3e4   : > { %v3104_v33 = vpop.eup %3103 }
 0x3e5   : > { %v2068_v17 = vmul.f32 1.442695, %v3852_v16  ;;  %2102 = vadd.xlane.f32.xlu0 %v3104_v33 }
 0x3e6   : > { %v2014_v18 = vpop.xlane.xlu0 %2013 }
 0x3e7   : > { %3107 = vpow2.f32 %v2068_v17  ;;  %v3856_v34 = vsub.f32 %v3780_v22, %v2014_v18 }
 0x3e8   : > { %v3106_v20 = vpop.eup %3105 }
 0x3e9   : > { %v2070_v21 = vmul.f32 1.442695, %v3856_v34  ;;  %2104 = vadd.xlane.f32.xlu1 %v3106_v20 }
 0x3ea   : > { %v2016_v23 = vpop.xlane.xlu1 %2015 }
 0x3eb   : > { %3109 = vpow2.f32 %v2070_v21  ;;  %v3860_v24 = vsub.f32 %v3784_v35, %v2016_v23 }
 0x3ed   : > { %v2072_v13 = vmul.f32 1.442695, %v3860_v24 }
 0x3ee   : > { %v2018_v26 = vpop.xlane.xlu0 %2017 }
 0x3ef   : > { %3111 = vpow2.f32 %v2072_v13  ;;  %v3864_v28 = vsub.f32 %v3788_v37, %v2018_v26 }
 0x3f1   : > { %v2074_v29 = vmul.f32 1.442695, %v3864_v28 }
 0x3f3   : > { %3113 = vpow2.f32 %v2074_v29 }
 0x3f4   : > { %v3108_v22 = vpop.eup %3107 }
 0x3f5   : > { %2106 = vadd.xlane.f32.xlu0 %v3108_v22 }
 0x3f8   : > { %v3110_v31 = vpop.eup %3109 }
 0x3f9   : > { %2108 = vadd.xlane.f32.xlu1 %v3110_v31 }
 0x3fa   : > { %v2020_v39 = vpop.xlane.xlu1 %2019 }
 0x3fb   : > { %v3868_v36 = vsub.f32 %v3792_v54, %v2020_v39 }
 0x3fc   : > { %v3112_v35 = vpop.eup %3111 }
 0x3fd   : > { %v2076_v38 = vmul.f32 1.442695, %v3868_v36  ;;  %2110 = vadd.xlane.f32.xlu0 %v3112_v35 }
 0x3fe   : > { %v2022_v41 = vpop.xlane.xlu0 %2021 }
 0x3ff   : > { %3115 = vpow2.f32 %v2076_v38  ;;  %v3872_v37 = vsub.f32 %v3796_v42, %v2022_v41 }
 0x400   : > { %v3114_v43 = vpop.eup %3113 }
 0x401   : > { %v2078_v44 = vmul.f32 1.442695, %v3872_v37  ;;  %2112 = vadd.xlane.f32.xlu1 %v3114_v43 }
 0x402   : > { %v2024_v46 = vpop.xlane.xlu1 %2023 }
 0x403   : > { %3117 = vpow2.f32 %v2078_v44  ;;  %v3876_v47 = vsub.f32 %v3800_v5, %v2024_v46 }
 0x405   : > { %v2080_v54 = vmul.f32 1.442695, %v3876_v47 }
 0x406   : > { %v2026_v49 = vpop.xlane.xlu0 %2025 }
 0x407   : > { %3119 = vpow2.f32 %v2080_v54  ;;  %v3880_v51 = vsub.f32 %v3804_v10, %v2026_v49 }
 0x409   : > { %v2082_v53 = vmul.f32 1.442695, %v3880_v51 }
 0x40b   : > { %3121 = vpow2.f32 %v2082_v53 }
 0x40c   : > { %v3116_v42 = vpop.eup %3115  ;;  %v2028_v55 = vpop.xlane.xlu1 %2027 }
 0x40d   : > { %v3884_v45 = vsub.f32 %v3808_v25, %v2028_v55  ;;  %2114 = vadd.xlane.f32.xlu0 %v3116_v42 }
 0x40f   : > { %v2084_v58 = vmul.f32 1.442695, %v3884_v45 }
 0x410   : > { %v3118_v5 = vpop.eup %3117  ;;  %v2030_v60 = vpop.xlane.xlu0 %2029 }
 0x411   : > { %3123 = vpow2.f32 %v2084_v58  ;;  %v3888_v61 = vsub.f32 %v3812_v40, %v2030_v60  ;;  %2116 = vadd.xlane.f32.xlu1 %v3118_v5 }
 0x413   : > { %v2086_v10 = vmul.f32 1.442695, %v3888_v61 }
 0x414   : > { %v3120_v32 = vpop.eup %3119  ;;  %v2032_v62 = vpop.xlane.xlu1 %2031 }
 0x415   : > { %3125 = vpow2.f32 %v2086_v10  ;;  %v3892_v19 = vsub.f32 %v3816_v50, %v2032_v62  ;;  %2118 = vadd.xlane.f32.xlu0 %v3120_v32 }
 0x417   : > { %v2088_v25 = vmul.f32 1.442695, %v3892_v19 }
 0x418   : > { %v3122_v1 = vpop.eup %3121 }
 0x419   : > { %3127 = vpow2.f32 %v2088_v25  ;;  %2120 = vadd.xlane.f32.xlu1 %v3122_v1 }
 0x41e   : > { %v3124_v27 = vpop.eup %3123 }
 0x41f   : > { %2122 = vadd.xlane.f32.xlu0 %v3124_v27 }
 0x422   : > { %v3126_v40 = vpop.eup %3125 }
 0x423   : > { %2124 = vadd.xlane.f32.xlu1 %v3126_v40 }
 0x426   : > { %v3128_v0 = vpop.eup %3127 }
 0x427   : > { %2126 = vadd.xlane.f32.xlu0 %v3128_v0 }
 0x44f   : > { %v2091_v2 = vpop.xlane.xlu0 %2090 }
 0x450   : > { %3129 = vlog2.f32 %v2091_v2 }
 0x453   : > { %v2093_v3 = vpop.xlane.xlu1 %2092 }
 0x454   : > { %3131 = vlog2.f32 %v2093_v3 }
 0x457   : > { %v2095_v50 = vpop.xlane.xlu0 %2094 }
 0x458   : > { %3133 = vlog2.f32 %v2095_v50 }
 0x45b   : > { %v2097_v4 = vpop.xlane.xlu1 %2096 }
 0x45c   : > { %3135 = vlog2.f32 %v2097_v4 }
 0x45d   : > { %v3130_v6 = vpop.eup %3129 }
 0x45e   : > { %v2129_v48 = vmul.f32 0.6931472, %v3130_v6 }
 0x460   : > { %v2166_v56 = vsub.f32 %v3820_v52, %v2129_v48 }
 0x461   : > { %v3132_v8 = vpop.eup %3131 }
 0x462   : > { %v2131_v12 = vmul.f32 0.6931472, %v3132_v8 }
 0x464   : > { %v2167_v14 = vsub.f32 %v3824_v57, %v2131_v12 }
 0x465   : > { %v3134_v15 = vpop.eup %3133 }
 0x466   : > { %v2592_v33 = vpack.c.bf16 %v2167_v14, %v2166_v56  ;;  %v2099_v17 = vpop.xlane.xlu0 %2098  ;;  %v2133_v18 = vmul.f32 0.6931472, %v3134_v15 }
 0x467   : > { %3137 = vlog2.f32 %v2099_v17 }
 0x468   : > { %2593 = vst [vmem:[%s3900_s29] sm:$0xff] %v2592_v33   ;;  %v2168_v13 = vsub.f32 %v3828_v59, %v2133_v18 }
 0x469   : > { %v3136_v20 = vpop.eup %3135 }
 0x46a   : > { %v2135_v21 = vmul.f32 0.6931472, %v3136_v20  ;;  %v2101_v23 = vpop.xlane.xlu1 %2100 }
 0x46b   : > { %3139 = vlog2.f32 %v2101_v23 }
 0x46c   : > { %v2169_v52 = vsub.f32 %v3832_v11, %v2135_v21 }
 0x46e   : > { %v2597_v57 = vpack.c.bf16 %v2169_v52, %v2168_v13  ;;  %v2103_v26 = vpop.xlane.xlu0 %2102 }
 0x46f   : > { %3141 = vlog2.f32 %v2103_v26 }
 0x470   : > { %2634 = vst [vmem:[%s3900_s29 + $0x8] sm:$0xff] %v2597_v57  }
 0x472   : > { %v2105_v29 = vpop.xlane.xlu1 %2104 }
 0x473   : > { %3143 = vlog2.f32 %v2105_v29 }
 0x474   : > { %v3138_v22 = vpop.eup %3137 }
 0x475   : > { %v2137_v31 = vmul.f32 0.6931472, %v3138_v22 }
 0x477   : > { %v2170_v38 = vsub.f32 %v3836_v63, %v2137_v31 }
 0x478   : > { %v3140_v39 = vpop.eup %3139 }
 0x479   : > { %v2139_v35 = vmul.f32 0.6931472, %v3140_v39 }
 0x47b   : > { %v2171_v41 = vsub.f32 %v3840_v30, %v2139_v35 }
 0x47c   : > { %v3142_v43 = vpop.eup %3141 }
 0x47d   : > { %v2602_v59 = vpack.c.bf16 %v2171_v41, %v2170_v38  ;;  %v2141_v11 = vmul.f32 0.6931472, %v3142_v43 }
 0x47e   : > { %v2107_v44 = vpop.xlane.xlu0 %2106 }
 0x47f   : > { %2635 = vst [vmem:[%s3900_s29 + $0x10] sm:$0xff] %v2602_v59   ;;  %3145 = vlog2.f32 %v2107_v44  ;;  %v2172_v53 = vsub.f32 %v3844_v7, %v2141_v11 }
 0x480   : > { %v3144_v46 = vpop.eup %3143 }
 0x481   : > { %v2143_v54 = vmul.f32 0.6931472, %v3144_v46 }
 0x482   : > { %v2109_v49 = vpop.xlane.xlu1 %2108 }
 0x483   : > { %v2173_v42 = vsub.f32 %v3848_v9, %v2143_v54  ;;  %3147 = vlog2.f32 %v2109_v49 }
 0x485   : > { %v2607_v55 = vpack.c.bf16 %v2173_v42, %v2172_v53 }
 0x486   : > { %v2111_v63 = vpop.xlane.xlu0 %2110 }
 0x487   : > { %2636 = vst [vmem:[%s3900_s29 + $0x18] sm:$0xff] %v2607_v55   ;;  %3149 = vlog2.f32 %v2111_v63 }
 0x48a   : > { %v2113_v30 = vpop.xlane.xlu1 %2112 }
 0x48b   : > { %3151 = vlog2.f32 %v2113_v30 }
 0x48c   : > { %v3146_v58 = vpop.eup %3145 }
 0x48d   : > { %v2145_v5 = vmul.f32 0.6931472, %v3146_v58 }
 0x48f   : > { %v2174_v32 = vsub.f32 %v3852_v16, %v2145_v5 }
 0x490   : > { %v3148_v60 = vpop.eup %3147 }
 0x491   : > { %v2147_v10 = vmul.f32 0.6931472, %v3148_v60 }
 0x493   : > { %v2175_v62 = vsub.f32 %v3856_v34, %v2147_v10 }
 0x494   : > { %v3150_v7 = vpop.eup %3149 }
 0x495   : > { %v2612_v25 = vpack.c.bf16 %v2175_v62, %v2174_v32  ;;  %v2149_v1 = vmul.f32 0.6931472, %v3150_v7 }
 0x496   : > { %v2115_v9 = vpop.xlane.xlu0 %2114 }
 0x497   : > { %2637 = vst [vmem:[%s3900_s29 + $0x20] sm:$0xff] %v2612_v25   ;;  %3153 = vlog2.f32 %v2115_v9  ;;  %v2176_v2 = vsub.f32 %v3860_v24, %v2149_v1 }
 0x498   : > { %v3152_v27 = vpop.eup %3151 }
 0x499   : > { %v2151_v40 = vmul.f32 0.6931472, %v3152_v27 }
 0x49a   : > { %v2117_v0 = vpop.xlane.xlu1 %2116 }
 0x49b   : > { %v2177_v3 = vsub.f32 %v3864_v28, %v2151_v40  ;;  %3155 = vlog2.f32 %v2117_v0 }
 0x49d   : > { %v2617_v50 = vpack.c.bf16 %v2177_v3, %v2176_v2 }
 0x49e   : > { %v2119_v4 = vpop.xlane.xlu0 %2118 }
 0x49f   : > { %2638 = vst [vmem:[%s3900_s29 + $0x28] sm:$0xff] %v2617_v50   ;;  %3157 = vlog2.f32 %v2119_v4 }
 0x4a2   : > { %v2121_v16 = vpop.xlane.xlu1 %2120 }
 0x4a3   : > { %3159 = vlog2.f32 %v2121_v16 }
 0x4a4   : > { %v3154_v34 = vpop.eup %3153 }
 0x4a5   : > { %v2153_v6 = vmul.f32 0.6931472, %v3154_v34 }
 0x4a7   : > { %v2178_v56 = vsub.f32 %v3868_v36, %v2153_v6 }
 0x4a8   : > { %v3156_v48 = vpop.eup %3155  ;;  %v2123_v8 = vpop.xlane.xlu0 %2122 }
 0x4a9   : > { %v2155_v12 = vmul.f32 0.6931472, %v3156_v48  ;;  %3161 = vlog2.f32 %v2123_v8 }
 0x4ab   : > { %v2179_v24 = vsub.f32 %v3872_v37, %v2155_v12 }
 0x4ac   : > { %v3158_v28 = vpop.eup %3157  ;;  %v2125_v14 = vpop.xlane.xlu1 %2124 }
 0x4ad   : > { %v2622_v15 = vpack.c.bf16 %v2179_v24, %v2178_v56  ;;  %3163 = vlog2.f32 %v2125_v14  ;;  %v2157_v33 = vmul.f32 0.6931472, %v3158_v28 }
 0x4af   : > { %2639 = vst [vmem:[%s3900_s29 + $0x30] sm:$0xff] %v2622_v15   ;;  %v2180_v21 = vsub.f32 %v3876_v47, %v2157_v33 }
 0x4b0   : > { %v3160_v17 = vpop.eup %3159  ;;  %v2127_v18 = vpop.xlane.xlu0 %2126 }
 0x4b1   : > { %v2159_v20 = vmul.f32 0.6931472, %v3160_v17  ;;  %3165 = vlog2.f32 %v2127_v18 }
 0x4b3   : > { %v2181_v36 = vsub.f32 %v3880_v51, %v2159_v20 }
 0x4b5   : > { %v2627_v23 = vpack.c.bf16 %v2181_v36, %v2180_v21 }
 0x4b6   : > { %v3162_v13 = vpop.eup %3161 }
 0x4b7   : > { %2640 = vst [vmem:[%s3900_s29 + $0x38] sm:$0xff] %v2627_v23   ;;  %v2161_v37 = vmul.f32 0.6931472, %v3162_v13 }
 0x4b9   : > { %v2182_v26 = vsub.f32 %v3884_v45, %v2161_v37 }
 0x4ba   : > { %v3164_v52 = vpop.eup %3163 }
 0x4bb   : > { %v2163_v57 = vmul.f32 0.6931472, %v3164_v52 }
 0x4bd   : > { %v2183_v29 = vsub.f32 %v3888_v61, %v2163_v57 }
 0x4be   : > { %v3166_v22 = vpop.eup %3165 }
 0x4bf   : > { %v2632_v31 = vpack.c.bf16 %v2183_v29, %v2182_v26  ;;  %v2165_v39 = vmul.f32 0.6931472, %v3166_v22 }
 0x4c1   : > { %2641 = vst [vmem:[%s3900_s29 + $0x40] sm:$0xff] %v2632_v31   ;;  %v2184_v47 = vsub.f32 %v3892_v19, %v2165_v39 }
 0x4c3   : > { %v2587_v51 = vpack.c.bf16 %v2184_v47, %v2184_v47 }
 0x4c5   : > { %2280 = vst [vmem:[%s3900_s29 + $0x48] sm:$0xf] %v2587_v51 }
 0x4c6   : > { %3232 = shalt.err (!%p3229_p3)
}
 0x4c7   : > { %s3233_s18 = scalar_lea.hbm %s3935_s13, 1216  ;;  %s3237_s26 = scalar_lea.hbm %s3986_s6, 2432 }
 0x4c8   : > { %p3234_p2 = scmp.ne.s32.totalorder %s3935_s13, %s3233_s18  ;;  %p3238_p7 = scmp.lt.s32.totalorder %s3935_s13, %s3986_s6 }
 0x4c9   : > { %p3239_p6 = scmp.lt.s32.totalorder %s3237_s26, %s3233_s18 }
 0x4ca   : > { %p3235_p4 = pnand %p3234_p2, %p3372_p5 }
 0x4cb   : > { %p3240_p9 = por %p3239_p6, %p3238_p7 }
 0x4cc   : > { %p3236_p13 = pneg %p3235_p4 }
 0x4ce   : > { %p3241_p10 = pnand %p3240_p9, %p3236_p13 }
 0x4d0   : > { %3244 = shalt.err (!%p3241_p10)
}
 0x4d1   : > { %s3297_s9 = smov 64   ;;  %s3298_s11 = smov 4  }
 0x4d2   : > { %2911 = dma.vmem_to_hbm [thread:$0]  (%p3372_p5), %s3930_s10, 1216, %s3935_s13, %s3940_s14, %s3297_s9, %s3297_s9, %s3298_s11  }
 0x4d3 PF: > { %p2928_p12 = scmp.ge.s32.totalorder %s3287_s24, 2  ;;  %s2310_s12 = sand.u32 1, %s3275_s21  }
 0x4d4   : > { %p3996_p8 = scmp.ne.s32.totalorder %s3989_s8, 0  ;;  %s2311_s25 = scalar_lea.sflag [#allocation4], %s2310_s12 }
 0x4d6   : > { %p2921_p11 = pnand %p2928_p12, %p3996_p8 }
 0x4d8   : > { %p2922_p0 = pneg %p2921_p11 }
 0x4da   : > { %3270 = dma.done.wait (%p2922_p0), %s2311_s25, 1216  }
 0x4db   : > { %3272 = vsyncadd (%p2922_p0), %s2311_s25, 4294966080  ;;  %p18_p1 = scmp.ge.s32.totalorder %s3359_s27, 4   ;;  %s3997_s21 = smov %s3279_s22 }
 0x4dc   : > { %s3998_s22 = smov %s3283_s23  ;;  %s3999_s23 = smov %s3370_s30 }
 0x4dd   : > { %s4000_s24 = smov %s3359_s27  ;;  %20 = sbr.rel (!%p18_p1) target bundleno = 5 (0x5), region = 89 }
 0x4e2   :  { %2316 = vsyncpa [#allocation3], 1 }
 0x4e3   :  { %2318 = vsyncpa [#allocation3 + $0x1], 1 }
 0x4e4   :  { %2319 = vsyncpa [#allocation6], 1 }
 0x4e5   :  { %2320 = vsyncpa [#allocation4], 1 }
 0x4e6   :  { %2322 = vsyncpa [#allocation4 + $0x1], 1 }

</bundles_post_ra>
